<compile_context>
chip_gen: v5e
topology: v5e:2x2
jax: 0.10.0
libtpu: 0.0.40
codegen_flags: <defaults>
</compile_context>

<pallas_src>
import functools

import jax
import jax.numpy as jnp
from jax import lax
from jax.experimental import pallas as pl
from jax.experimental.pallas import tpu as pltpu

LANE = 128


def _round_up(x, m):
    return ((x + m - 1) // m) * m


def _vmem_limit_bytes():
    """Per-generation scoped-VMEM budget (~75% of physical; conservative fallback)."""
    cap = None
    try:
        info = pltpu.get_tpu_info()
        cap = getattr(info, "vmem_capacity_bytes", None)
    except Exception:
        cap = None
    if not cap or cap <= 0:
        cap = 64 * 1024 * 1024  # v7x per-TC size; safe everywhere
    return int(cap) * 3 // 4


def _exclusive_cumsum_lanes(x):
    """Exclusive prefix-sum along the last (lane) axis via log2(n) XLU rolls."""
    n = x.shape[-1]
    col = lax.broadcasted_iota(jnp.int32, x.shape, x.ndim - 1)
    acc = x
    off = 1
    while off < n:
        shifted = pltpu.roll(acc, shift=off, axis=x.ndim - 1)
        acc = acc + jnp.where(col >= off, shifted, 0.0)
        off *= 2
    return acc - x


def _heads_epilogue(class_num, F, alpha_ref, acc,
                    br_ref, w1_ref, b1_ref, w2_ref, b2_ref,
                    z_ref, c_ref, lp_ref):
    """acc: [tm, R] f32 pre-bias backbone output. Writes z / c / per-element log-prob."""
    h = jnp.maximum(acc + br_ref[...], 0.0)                       # backbone ReLU
    hb = h.astype(jnp.bfloat16)

    # fused projector layer 1: [tm,R] @ [R, 2R]  (instance | cluster), ReLU
    tu = jnp.dot(hb, w1_ref[...], preferred_element_type=jnp.float32) + b1_ref[...]
    tu = jnp.maximum(tu, 0.0)

    # fused (block-diagonal) projector layer 2: [tm,2R] @ [2R, F+Kc]
    zo = jnp.dot(tu.astype(jnp.bfloat16), w2_ref[...],
                 preferred_element_type=jnp.float32) + b2_ref[...]
    z = zo[:, :F]                                                 # instance head
    logits = zo[:, F:]                                            # cluster head

    # instance head: L2-normalize (matches torch normalize eps=1e-12)
    sumsq = jnp.sum(z * z, axis=1, keepdims=True)
    z_ref[...] = z * lax.rsqrt(jnp.maximum(sumsq, 1e-24))

    # cluster head: masked softmax over real class columns, EXACT division
    col = lax.broadcasted_iota(jnp.int32, logits.shape, 1)
    valid_cls = col < class_num
    logits = jnp.where(valid_cls, logits, -1e30)
    logits = logits - jnp.max(logits, axis=1, keepdims=True)
    e = jnp.exp(logits)
    c = e / jnp.sum(e, axis=1, keepdims=True)
    c = jnp.where(valid_cls, c, 0.0)
    c_ref[...] = c

    # stick-breaking per-element Beta(1, alpha) log-prob for columns 0..K-2
    cum_excl = _exclusive_cumsum_lanes(c)
    denom = 1.0 - cum_excl
    neg = denom <= 0.0
    beta = jnp.where(neg, 0.0, c / jnp.where(neg, 1.0, denom))
    beta = jnp.minimum(beta, 0.9999999)
    # Beta(1, alpha).log_prob(x) = log(alpha) + (alpha - 1) * log(1 - x)
    # NOTE: for c_k == 0 torch yields nan (0*log 0); we keep the finite value log(alpha).
    lp = alpha_ref[0] + alpha_ref[1] * jnp.log(1.0 - beta)
    lp = jnp.where(neg, 0.0, lp)
    lp = jnp.where(col < (class_num - 1), lp, 0.0)
    lp_ref[...] = lp


def _network_kernel_fullk(class_num, F,
                          alpha_ref, x_ref, wr_ref, br_ref, w1_ref, b1_ref,
                          w2_ref, b2_ref, z_ref, c_ref, lp_ref):
    # whole Din reduction in one MXU call (wr resident in VMEM)
    acc = jnp.dot(x_ref[...], wr_ref[...], preferred_element_type=jnp.float32)
    _heads_epilogue(class_num, F, alpha_ref, acc, br_ref, w1_ref, b1_ref,
                    w2_ref, b2_ref, z_ref, c_ref, lp_ref)


def _network_kernel_ksplit(class_num, F,
                           alpha_ref, x_ref, wr_ref, br_ref, w1_ref, b1_ref,
                           w2_ref, b2_ref, z_ref, c_ref, lp_ref, acc_ref):
    k = pl.program_id(1)

    @pl.when(k == 0)
    def _():
        acc_ref[...] = jnp.zeros_like(acc_ref)

    acc_ref[...] += jnp.dot(x_ref[...], wr_ref[...],
                            preferred_element_type=jnp.float32)

    @pl.when(k == pl.num_programs(1) - 1)
    def _():
        _heads_epilogue(class_num, F, alpha_ref, acc_ref[...], br_ref, w1_ref,
                        b1_ref, w2_ref, b2_ref, z_ref, c_ref, lp_ref)


def _pad2(w, rows, cols, dtype):
    out = jnp.zeros((rows, cols), dtype)
    return out.at[:w.shape[0], :w.shape[1]].set(w.astype(dtype))


def _pick_tm(M):
    """Large batch tiles for MXU fill / HBM traffic, but keep >=2 tiles (v7x 2 TCs)."""
    M16 = _round_up(M, 16)          # bf16 sublane packing
    if M16 <= 128:
        return M16
    for cand in (512, 256):
        if M16 >= 2 * cand:
            return cand
    return 128


def _fullk_vmem_bytes(tm, Dp, R, F, Kc):
    weights = (Dp * R + R * 2 * R + 2 * R * (F + Kc)) * 2          # bf16, single-buffered
    biases = (R + 2 * R + F + Kc) * 4
    x_buf = 2 * tm * Dp * 2                                        # x double-buffered
    outs = 2 * tm * (F + 2 * Kc) * 4                               # outputs double-buffered
    work = 8 * tm * max(2 * R, F + Kc) * 4                         # live f32 temporaries
    return weights + biases + x_buf + outs + work


def _ksplit_vmem_bytes(tm, tk, R, F, Kc):
    weights = (R * 2 * R + 2 * R * (F + Kc)) * 2
    biases = (R + 2 * R + F + Kc) * 4
    stream = 2 * (tm * tk + tk * R) * 2                            # x + wr double-buffered
    outs = 2 * tm * (F + 2 * Kc) * 4
    acc = tm * R * 4
    work = 8 * tm * max(2 * R, F + Kc) * 4
    return weights + biases + stream + outs + acc + work


def _forward_all(params, xi_flat, xj_flat, alpha):
    """xi_flat/xj_flat: [B, Din] bf16. Returns lane-sliced z, c, per-element log-prob."""
    B, Din = xi_flat.shape
    M = 2 * B
    rep_dim = params["wr"].shape[1]
    feature_dim = params["wi2"].shape[1]
    class_num = params["wc2"].shape[1]

    R = _round_up(rep_dim, LANE)
    F = _round_up(feature_dim, LANE)
    Kc = _round_up(class_num, LANE)

    vmem_limit = _vmem_limit_bytes()
    budget = (vmem_limit * 4) // 5

    tm = _pick_tm(M)
    Dp_full = _round_up(Din, LANE)
    use_fullk = _fullk_vmem_bytes(tm, Dp_full, R, F, Kc) <= budget

    if use_fullk:
        tk = Dp_full
        Dp = Dp_full
    else:
        tk = 256
        for cand in (2048, 1024, 512):
            if cand <= Dp_full and _ksplit_vmem_bytes(tm, cand, R, F, Kc) <= budget:
                tk = cand
                break
        while tm > 16 and _ksplit_vmem_bytes(tm, tk, R, F, Kc) > budget:
            tm = max(16, tm // 2)
        Dp = _round_up(Din, tk)
    Mp = _round_up(M, tm)

    # -------- fused pad + stack of both views (already bf16; one pass) --------
    xp = jnp.zeros((Mp, Dp), jnp.bfloat16)
    xp = xp.at[:B, :Din].set(xi_flat)
    xp = xp.at[B:2 * B, :Din].set(xj_flat)

    # -------- padded weights (MXU operands bf16, biases f32) --------
    wr_p = _pad2(params["wr"], Dp, R, jnp.bfloat16)
    br_p = _pad2(params["br"], 1, R, jnp.float32)
    w1f = jnp.concatenate([_pad2(params["wi1"], R, R, jnp.bfloat16),
                           _pad2(params["wc1"], R, R, jnp.bfloat16)], axis=1)   # [R, 2R]
    b1f = jnp.concatenate([_pad2(params["bi1"], 1, R, jnp.float32),
                           _pad2(params["bc1"], 1, R, jnp.float32)], axis=1)    # [1, 2R]
    # block-diagonal fused second layer  [[wi2, 0], [0, wc2]] : [2R, F+Kc]
    w2f = jnp.zeros((2 * R, F + Kc), jnp.bfloat16)
    w2f = w2f.at[:rep_dim, :feature_dim].set(params["wi2"].astype(jnp.bfloat16))
    w2f = w2f.at[R:R + rep_dim, F:F + class_num].set(params["wc2"].astype(jnp.bfloat16))
    b2f = jnp.zeros((1, F + Kc), jnp.float32)
    b2f = b2f.at[:, :feature_dim].set(params["bi2"].astype(jnp.float32))
    b2f = b2f.at[:, F:F + class_num].set(params["bc2"].astype(jnp.float32))

    alpha_v = jnp.asarray(alpha, jnp.float32)
    alpha_arr = jnp.stack([jnp.log(alpha_v), alpha_v - 1.0]).astype(jnp.float32)

    out_shape = (
        jax.ShapeDtypeStruct((Mp, F), jnp.float32),
        jax.ShapeDtypeStruct((Mp, Kc), jnp.float32),
        jax.ShapeDtypeStruct((Mp, Kc), jnp.float32),
    )
    const = pl.Buffered(1)   # constant-index operands: no useless double-buffer

    if use_fullk:
        kernel = functools.partial(_network_kernel_fullk, class_num, F)
        z_p, c_p, lp_p = pl.pallas_call(
            kernel,
            grid=(Mp // tm,),
            in_specs=[
                pl.BlockSpec(memory_space=pltpu.MemorySpace.SMEM),                    # alpha
                pl.BlockSpec((tm, Dp), lambda i: (i, 0)),                             # x
                pl.BlockSpec((Dp, R), lambda i: (0, 0), pipeline_mode=const),         # wr (resident)
                pl.BlockSpec((1, R), lambda i: (0, 0), pipeline_mode=const),          # br
                pl.BlockSpec((R, 2 * R), lambda i: (0, 0), pipeline_mode=const),      # w1
                pl.BlockSpec((1, 2 * R), lambda i: (0, 0), pipeline_mode=const),      # b1
                pl.BlockSpec((2 * R, F + Kc), lambda i: (0, 0), pipeline_mode=const), # w2
                pl.BlockSpec((1, F + Kc), lambda i: (0, 0), pipeline_mode=const),     # b2
            ],
            out_specs=(
                pl.BlockSpec((tm, F), lambda i: (i, 0)),
                pl.BlockSpec((tm, Kc), lambda i: (i, 0)),
                pl.BlockSpec((tm, Kc), lambda i: (i, 0)),
            ),
            out_shape=out_shape,
            compiler_params=pltpu.CompilerParams(
                dimension_semantics=("parallel",),
                vmem_limit_bytes=vmem_limit,
            ),
        )(alpha_arr, xp, wr_p, br_p, w1f, b1f, w2f, b2f)
    else:
        kernel = functools.partial(_network_kernel_ksplit, class_num, F)
        z_p, c_p, lp_p = pl.pallas_call(
            kernel,
            grid=(Mp // tm, Dp // tk),
            in_specs=[
                pl.BlockSpec(memory_space=pltpu.MemorySpace.SMEM),                       # alpha
                pl.BlockSpec((tm, tk), lambda i, k: (i, k)),                             # x
                pl.BlockSpec((tk, R), lambda i, k: (k, 0)),                              # wr
                pl.BlockSpec((1, R), lambda i, k: (0, 0), pipeline_mode=const),          # br
                pl.BlockSpec((R, 2 * R), lambda i, k: (0, 0), pipeline_mode=const),      # w1
                pl.BlockSpec((1, 2 * R), lambda i, k: (0, 0), pipeline_mode=const),      # b1
                pl.BlockSpec((2 * R, F + Kc), lambda i, k: (0, 0), pipeline_mode=const), # w2
                pl.BlockSpec((1, F + Kc), lambda i, k: (0, 0), pipeline_mode=const),     # b2
            ],
            out_specs=(
                pl.BlockSpec((tm, F), lambda i, k: (i, 0)),
                pl.BlockSpec((tm, Kc), lambda i, k: (i, 0)),
                pl.BlockSpec((tm, Kc), lambda i, k: (i, 0)),
            ),
            out_shape=out_shape,
            scratch_shapes=[pltpu.VMEM((tm, R), jnp.float32)],
            compiler_params=pltpu.CompilerParams(
                dimension_semantics=("parallel", "arbitrary"),
                vmem_limit_bytes=vmem_limit,
            ),
        )(alpha_arr, xp, wr_p, br_p, w1f, b1f, w2f, b2f)

    z = z_p[:M, :feature_dim]
    c = c_p[:M, :class_num]
    lp = lp_p[:M, :class_num - 1]
    return z, c, lp


def network_forward(params, x_i, x_j, alpha):
    """Mirrors Network.forward: returns (z_i, z_j, c_i, c_j, s_i, s_j)."""
    B = x_i.shape[0]
    # cast to bf16 at the flatten step (halves wrapper HBM traffic for large Din)
    xi_flat = x_i.reshape(B, -1).astype(jnp.bfloat16)   # NCHW row-major flatten (torch .view)
    xj_flat = x_j.reshape(B, -1).astype(jnp.bfloat16)

    z_all, c_all, lp_all = _forward_all(params, xi_flat, xj_flat, alpha)

    z_i, z_j = z_all[:B], z_all[B:]
    c_i, c_j = c_all[:B], c_all[B:]

    def branch_mean_logprob(lp):
        # mean over nonzero entries (matches torch log_prob[log_prob != 0].mean();
        # 0/0 -> nan exactly as torch's mean of an empty tensor).
        nz = (lp != 0.0).astype(jnp.float32)
        return jnp.sum(lp * nz) / jnp.sum(nz)

    s_i = branch_mean_logprob(lp_all[:B])
    s_j = branch_mean_logprob(lp_all[B:])
    return z_i, z_j, c_i, c_j, s_i, s_j


def init_params(key, d_in, rep_dim, feature_dim, class_num):
    ks = jax.random.split(key, 10)

    def lin(k, fan_in, fan_out):
        scale = 1.0 / jnp.sqrt(jnp.float32(fan_in))
        return jax.random.uniform(k, (fan_in, fan_out), jnp.float32, -scale, scale)

    return {
        # backbone (stand-in resnet)
        "wr": lin(ks[0], d_in, rep_dim),
        "br": jax.random.uniform(ks[1], (1, rep_dim), jnp.float32, -0.1, 0.1),
        # instance projector
        "wi1": lin(ks[2], rep_dim, rep_dim),
        "bi1": jax.random.uniform(ks[3], (1, rep_dim), jnp.float32, -0.1, 0.1),
        "wi2": lin(ks[4], rep_dim, feature_dim),
        "bi2": jax.random.uniform(ks[5], (1, feature_dim), jnp.float32, -0.1, 0.1),
        # cluster projector
        "wc1": lin(ks[6], rep_dim, rep_dim),
        "bc1": jax.random.uniform(ks[7], (1, rep_dim), jnp.float32, -0.1, 0.1),
        "wc2": lin(ks[8], rep_dim, class_num),
        "bc2": jax.random.uniform(ks[9], (1, class_num), jnp.float32, -0.1, 0.1),
    }


if __name__ == "__main__":
    B, C, H, W = 2, 4, 16, 16
    rep_dim = 32
    feature_dim = 16
    class_num = 10
    alpha = 2.0

    key = jax.random.PRNGKey(0)
    k_xi, k_xj, k_p = jax.random.split(key, 3)
    x_i = jax.random.normal(k_xi, (B, C, H, W), jnp.float32)   # NCHW
    x_j = jax.random.normal(k_xj, (B, C, H, W), jnp.float32)   # NCHW

    params = init_params(k_p, C * H * W, rep_dim, feature_dim, class_num)

    fwd = jax.jit(network_forward)        # fuses wrapper pad/cast with the kernel call
    outs = fwd(params, x_i, x_j, alpha)
    outs = jax.block_until_ready(outs)

    z_i, z_j, c_i, c_j, s_i, s_j = outs
    assert z_i.shape == (B, feature_dim) and z_j.shape == (B, feature_dim)
    assert c_i.shape == (B, class_num) and c_j.shape == (B, class_num)
    assert s_i.shape == () and s_j.shape == ()
    print("KERNEL_OK")
</pallas_src>

<mosaic_0001>
module attributes {stable_mosaic.version = 11 : i64} {
  func.func @_network_kernel_fullk(%arg0: i32, %arg1: memref<2xf32, #tpu.memory_space<smem>>, %arg2: memref<16x1024xbf16, #tpu.memory_space<vmem>>, %arg3: memref<1024x128xbf16, #tpu.memory_space<vmem>>, %arg4: memref<1x128xf32, #tpu.memory_space<vmem>>, %arg5: memref<128x256xbf16, #tpu.memory_space<vmem>>, %arg6: memref<1x256xf32, #tpu.memory_space<vmem>>, %arg7: memref<256x256xbf16, #tpu.memory_space<vmem>>, %arg8: memref<1x256xf32, #tpu.memory_space<vmem>>, %arg9: memref<16x128xf32, #tpu.memory_space<vmem>>, %arg10: memref<16x128xf32, #tpu.memory_space<vmem>>, %arg11: memref<16x128xf32, #tpu.memory_space<vmem>>) attributes {dimension_semantics = [#tpu.dimension_semantics<parallel>], iteration_bounds = array<i64: 1>, scalar_prefetch = 0 : i64, scratch_operands = 0 : i64, tpu.core_type = #tpu.core_type<tc>, window_params = [{transform_indices = @transform_0, window_bounds = array<i64: 2>}, {transform_indices = @transform_1, window_bounds = array<i64: 16, 1024>}, {pipeline_mode = #tpu.pipeline_mode<synchronous>, transform_indices = @transform_2, window_bounds = array<i64: 1024, 128>}, {pipeline_mode = #tpu.pipeline_mode<synchronous>, transform_indices = @transform_3, window_bounds = array<i64: 1, 128>}, {pipeline_mode = #tpu.pipeline_mode<synchronous>, transform_indices = @transform_4, window_bounds = array<i64: 128, 256>}, {pipeline_mode = #tpu.pipeline_mode<synchronous>, transform_indices = @transform_5, window_bounds = array<i64: 1, 256>}, {pipeline_mode = #tpu.pipeline_mode<synchronous>, transform_indices = @transform_6, window_bounds = array<i64: 256, 256>}, {pipeline_mode = #tpu.pipeline_mode<synchronous>, transform_indices = @transform_7, window_bounds = array<i64: 1, 256>}, {transform_indices = @transform_8, window_bounds = array<i64: 16, 128>}, {transform_indices = @transform_9, window_bounds = array<i64: 16, 128>}, {transform_indices = @transform_10, window_bounds = array<i64: 16, 128>}]} {
    %c0 = arith.constant 0 : index
    %c0_0 = arith.constant 0 : index
    %0 = vector.load %arg2[%c0, %c0_0] : memref<16x1024xbf16, #tpu.memory_space<vmem>>, vector<16x1024xbf16>
    %c0_1 = arith.constant 0 : index
    %c0_2 = arith.constant 0 : index
    %1 = vector.load %arg3[%c0_1, %c0_2] : memref<1024x128xbf16, #tpu.memory_space<vmem>>, vector<1024x128xbf16>
    %cst = arith.constant dense<0.000000e+00> : vector<16x128xf32>
    %2 = tpu.matmul %0, %1, %cst {dimension_numbers = #tpu.dot_dimension_numbers<[1], [0], [0], [1], [0, 0, 1, 1], [], []>} : vector<16x1024xbf16>, vector<1024x128xbf16>, vector<16x128xf32> -> vector<16x128xf32>
    %c0_3 = arith.constant 0 : index
    %c0_4 = arith.constant 0 : index
    %3 = vector.load %arg4[%c0_3, %c0_4] : memref<1x128xf32, #tpu.memory_space<vmem>>, vector<1x128xf32>
    %4 = vector.broadcast %3 : vector<1x128xf32> to vector<16x128xf32>
    %5 = arith.addf %2, %4 : vector<16x128xf32>
    %cst_5 = arith.constant 0.000000e+00 : f32
    %6 = vector.broadcast %cst_5 : f32 to vector<16x128xf32>
    %7 = arith.maximumf %5, %6 : vector<16x128xf32>
    %8 = arith.truncf %7 : vector<16x128xf32> to vector<16x128xbf16>
    %c0_6 = arith.constant 0 : index
    %c0_7 = arith.constant 0 : index
    %9 = vector.load %arg5[%c0_6, %c0_7] : memref<128x256xbf16, #tpu.memory_space<vmem>>, vector<128x256xbf16>
    %cst_8 = arith.constant dense<0.000000e+00> : vector<16x256xf32>
    %10 = tpu.matmul %8, %9, %cst_8 {dimension_numbers = #tpu.dot_dimension_numbers<[1], [0], [0], [1], [0, 0, 1, 1], [], []>} : vector<16x128xbf16>, vector<128x256xbf16>, vector<16x256xf32> -> vector<16x256xf32>
    %c0_9 = arith.constant 0 : index
    %c0_10 = arith.constant 0 : index
    %11 = vector.load %arg6[%c0_9, %c0_10] : memref<1x256xf32, #tpu.memory_space<vmem>>, vector<1x256xf32>
    %12 = vector.broadcast %11 : vector<1x256xf32> to vector<16x256xf32>
    %13 = arith.addf %10, %12 : vector<16x256xf32>
    %cst_11 = arith.constant 0.000000e+00 : f32
    %14 = vector.broadcast %cst_11 : f32 to vector<16x256xf32>
    %15 = arith.maximumf %13, %14 : vector<16x256xf32>
    %16 = arith.truncf %15 : vector<16x256xf32> to vector<16x256xbf16>
    %c0_12 = arith.constant 0 : index
    %c0_13 = arith.constant 0 : index
    %17 = vector.load %arg7[%c0_12, %c0_13] : memref<256x256xbf16, #tpu.memory_space<vmem>>, vector<256x256xbf16>
    %cst_14 = arith.constant dense<0.000000e+00> : vector<16x256xf32>
    %18 = tpu.matmul %16, %17, %cst_14 {dimension_numbers = #tpu.dot_dimension_numbers<[1], [0], [0], [1], [0, 0, 1, 1], [], []>} : vector<16x256xbf16>, vector<256x256xbf16>, vector<16x256xf32> -> vector<16x256xf32>
    %c0_15 = arith.constant 0 : index
    %c0_16 = arith.constant 0 : index
    %19 = vector.load %arg8[%c0_15, %c0_16] : memref<1x256xf32, #tpu.memory_space<vmem>>, vector<1x256xf32>
    %20 = vector.broadcast %19 : vector<1x256xf32> to vector<16x256xf32>
    %21 = arith.addf %18, %20 : vector<16x256xf32>
    %22 = vector.extract_strided_slice %21 {offsets = [0, 0], sizes = [16, 128], strides = [1, 1]} : vector<16x256xf32> to vector<16x128xf32>
    %23 = vector.extract_strided_slice %21 {offsets = [0, 128], sizes = [16, 128], strides = [1, 1]} : vector<16x256xf32> to vector<16x128xf32>
    %24 = arith.mulf %22, %22 : vector<16x128xf32>
    %cst_17 = arith.constant dense<0.000000e+00> : vector<16xf32>
    %25 = vector.multi_reduction <add>, %24, %cst_17 [1] : vector<16x128xf32> to vector<16xf32>
    %26 = vector.shape_cast %25 : vector<16xf32> to vector<16x1xf32>
    %cst_18 = arith.constant 1.000000e-24 : f32
    %27 = vector.broadcast %cst_18 : f32 to vector<16x1xf32>
    %28 = arith.maximumf %26, %27 : vector<16x1xf32>
    %29 = math.rsqrt %28 : vector<16x1xf32>
    %30 = vector.broadcast %29 : vector<16x1xf32> to vector<16x128xf32>
    %31 = arith.mulf %22, %30 : vector<16x128xf32>
    %c0_19 = arith.constant 0 : index
    %c0_20 = arith.constant 0 : index
    %32 = vector.load %arg9[%c0_19, %c0_20] : memref<16x128xf32, #tpu.memory_space<vmem>>, vector<16x128xf32>
    tpu.vector_store %arg9[%c0_19, %c0_20], %31 {strides = array<i32>} : memref<16x128xf32, #tpu.memory_space<vmem>>, vector<16x128xf32>,
    %33 = tpu.iota {dimensions = array<i32: 1>} : vector<16x128xi32>
    %c10_i32 = arith.constant 10 : i32
    %34 = vector.broadcast %c10_i32 : i32 to vector<16x128xi32>
    %35 = arith.cmpi slt, %33, %34 : vector<16x128xi32>
    %cst_21 = arith.constant -1.000000e+30 : f32
    %36 = vector.broadcast %cst_21 : f32 to vector<16x128xf32>
    %37 = arith.select %35, %23, %36 : vector<16x128xi1>, vector<16x128xf32>
    %cst_22 = arith.constant dense<0xFF800000> : vector<16xf32>
    %38 = vector.multi_reduction <maximumf>, %37, %cst_22 [1] : vector<16x128xf32> to vector<16xf32>
    %39 = vector.shape_cast %38 : vector<16xf32> to vector<16x1xf32>
    %40 = vector.broadcast %39 : vector<16x1xf32> to vector<16x128xf32>
    %41 = arith.subf %37, %40 : vector<16x128xf32>
    %42 = math.exp %41 : vector<16x128xf32>
    %cst_23 = arith.constant dense<0.000000e+00> : vector<16xf32>
    %43 = vector.multi_reduction <add>, %42, %cst_23 [1] : vector<16x128xf32> to vector<16xf32>
    %44 = vector.shape_cast %43 : vector<16xf32> to vector<16x1xf32>
    %45 = vector.broadcast %44 : vector<16x1xf32> to vector<16x128xf32>
    %46 = arith.divf %42, %45 : vector<16x128xf32>
    %cst_24 = arith.constant 0.000000e+00 : f32
    %47 = vector.broadcast %cst_24 : f32 to vector<16x128xf32>
    %48 = arith.select %35, %46, %47 : vector<16x128xi1>, vector<16x128xf32>
    %c0_25 = arith.constant 0 : index
    %c0_26 = arith.constant 0 : index
    %49 = vector.load %arg10[%c0_25, %c0_26] : memref<16x128xf32, #tpu.memory_space<vmem>>, vector<16x128xf32>
    tpu.vector_store %arg10[%c0_25, %c0_26], %48 {strides = array<i32>} : memref<16x128xf32, #tpu.memory_space<vmem>>, vector<16x128xf32>,
    %50 = tpu.iota {dimensions = array<i32: 1>} : vector<16x128xi32>
    %c1_i32 = arith.constant 1 : i32
    %51 = tpu.dynamic_rotate %48 by %c1_i32 dim 1 : vector<16x128xf32>, i32 -> vector<16x128xf32>
    %c1_i32_27 = arith.constant 1 : i32
    %52 = vector.broadcast %c1_i32_27 : i32 to vector<16x128xi32>
    %53 = arith.cmpi sge, %50, %52 : vector<16x128xi32>
    %cst_28 = arith.constant 0.000000e+00 : f32
    %54 = vector.broadcast %cst_28 : f32 to vector<16x128xf32>
    %55 = arith.select %53, %51, %54 : vector<16x128xi1>, vector<16x128xf32>
    %56 = arith.addf %48, %55 : vector<16x128xf32>
    %c2_i32 = arith.constant 2 : i32
    %57 = tpu.dynamic_rotate %56 by %c2_i32 dim 1 : vector<16x128xf32>, i32 -> vector<16x128xf32>
    %c2_i32_29 = arith.constant 2 : i32
    %58 = vector.broadcast %c2_i32_29 : i32 to vector<16x128xi32>
    %59 = arith.cmpi sge, %50, %58 : vector<16x128xi32>
    %cst_30 = arith.constant 0.000000e+00 : f32
    %60 = vector.broadcast %cst_30 : f32 to vector<16x128xf32>
    %61 = arith.select %59, %57, %60 : vector<16x128xi1>, vector<16x128xf32>
    %62 = arith.addf %56, %61 : vector<16x128xf32>
    %c4_i32 = arith.constant 4 : i32
    %63 = tpu.dynamic_rotate %62 by %c4_i32 dim 1 : vector<16x128xf32>, i32 -> vector<16x128xf32>
    %c4_i32_31 = arith.constant 4 : i32
    %64 = vector.broadcast %c4_i32_31 : i32 to vector<16x128xi32>
    %65 = arith.cmpi sge, %50, %64 : vector<16x128xi32>
    %cst_32 = arith.constant 0.000000e+00 : f32
    %66 = vector.broadcast %cst_32 : f32 to vector<16x128xf32>
    %67 = arith.select %65, %63, %66 : vector<16x128xi1>, vector<16x128xf32>
    %68 = arith.addf %62, %67 : vector<16x128xf32>
    %c8_i32 = arith.constant 8 : i32
    %69 = tpu.dynamic_rotate %68 by %c8_i32 dim 1 : vector<16x128xf32>, i32 -> vector<16x128xf32>
    %c8_i32_33 = arith.constant 8 : i32
    %70 = vector.broadcast %c8_i32_33 : i32 to vector<16x128xi32>
    %71 = arith.cmpi sge, %50, %70 : vector<16x128xi32>
    %cst_34 = arith.constant 0.000000e+00 : f32
    %72 = vector.broadcast %cst_34 : f32 to vector<16x128xf32>
    %73 = arith.select %71, %69, %72 : vector<16x128xi1>, vector<16x128xf32>
    %74 = arith.addf %68, %73 : vector<16x128xf32>
    %c16_i32 = arith.constant 16 : i32
    %75 = tpu.dynamic_rotate %74 by %c16_i32 dim 1 : vector<16x128xf32>, i32 -> vector<16x128xf32>
    %c16_i32_35 = arith.constant 16 : i32
    %76 = vector.broadcast %c16_i32_35 : i32 to vector<16x128xi32>
    %77 = arith.cmpi sge, %50, %76 : vector<16x128xi32>
    %cst_36 = arith.constant 0.000000e+00 : f32
    %78 = vector.broadcast %cst_36 : f32 to vector<16x128xf32>
    %79 = arith.select %77, %75, %78 : vector<16x128xi1>, vector<16x128xf32>
    %80 = arith.addf %74, %79 : vector<16x128xf32>
    %c32_i32 = arith.constant 32 : i32
    %81 = tpu.dynamic_rotate %80 by %c32_i32 dim 1 : vector<16x128xf32>, i32 -> vector<16x128xf32>
    %c32_i32_37 = arith.constant 32 : i32
    %82 = vector.broadcast %c32_i32_37 : i32 to vector<16x128xi32>
    %83 = arith.cmpi sge, %50, %82 : vector<16x128xi32>
    %cst_38 = arith.constant 0.000000e+00 : f32
    %84 = vector.broadcast %cst_38 : f32 to vector<16x128xf32>
    %85 = arith.select %83, %81, %84 : vector<16x128xi1>, vector<16x128xf32>
    %86 = arith.addf %80, %85 : vector<16x128xf32>
    %c64_i32 = arith.constant 64 : i32
    %87 = tpu.dynamic_rotate %86 by %c64_i32 dim 1 : vector<16x128xf32>, i32 -> vector<16x128xf32>
    %c64_i32_39 = arith.constant 64 : i32
    %88 = vector.broadcast %c64_i32_39 : i32 to vector<16x128xi32>
    %89 = arith.cmpi sge, %50, %88 : vector<16x128xi32>
    %cst_40 = arith.constant 0.000000e+00 : f32
    %90 = vector.broadcast %cst_40 : f32 to vector<16x128xf32>
    %91 = arith.select %89, %87, %90 : vector<16x128xi1>, vector<16x128xf32>
    %92 = arith.addf %86, %91 : vector<16x128xf32>
    %93 = arith.subf %92, %48 : vector<16x128xf32>
    %cst_41 = arith.constant 1.000000e+00 : f32
    %94 = vector.broadcast %cst_41 : f32 to vector<16x128xf32>
    %95 = arith.subf %94, %93 : vector<16x128xf32>
    %cst_42 = arith.constant 0.000000e+00 : f32
    %96 = vector.broadcast %cst_42 : f32 to vector<16x128xf32>
    %97 = arith.cmpf ole, %95, %96 : vector<16x128xf32>
    %cst_43 = arith.constant 1.000000e+00 : f32
    %98 = vector.broadcast %cst_43 : f32 to vector<16x128xf32>
    %99 = arith.select %97, %98, %95 : vector<16x128xi1>, vector<16x128xf32>
    %100 = arith.divf %48, %99 : vector<16x128xf32>
    %cst_44 = arith.constant 0.000000e+00 : f32
    %101 = vector.broadcast %cst_44 : f32 to vector<16x128xf32>
    %102 = arith.select %97, %101, %100 : vector<16x128xi1>, vector<16x128xf32>
    %cst_45 = arith.constant 0.99999988 : f32
    %103 = vector.broadcast %cst_45 : f32 to vector<16x128xf32>
    %104 = arith.minimumf %102, %103 : vector<16x128xf32>
    %c0_46 = arith.constant 0 : index
    %105 = memref.load %arg1[%c0_46] : memref<2xf32, #tpu.memory_space<smem>>
    %c1 = arith.constant 1 : index
    %106 = memref.load %arg1[%c1] : memref<2xf32, #tpu.memory_space<smem>>
    %cst_47 = arith.constant 1.000000e+00 : f32
    %107 = vector.broadcast %cst_47 : f32 to vector<16x128xf32>
    %108 = arith.subf %107, %104 : vector<16x128xf32>
    %109 = math.log %108 : vector<16x128xf32>
    %110 = vector.broadcast %106 : f32 to vector<16x128xf32>
    %111 = arith.mulf %110, %109 : vector<16x128xf32>
    %112 = vector.broadcast %105 : f32 to vector<16x128xf32>
    %113 = arith.addf %112, %111 : vector<16x128xf32>
    %cst_48 = arith.constant 0.000000e+00 : f32
    %114 = vector.broadcast %cst_48 : f32 to vector<16x128xf32>
    %115 = arith.select %97, %114, %113 : vector<16x128xi1>, vector<16x128xf32>
    %c9_i32 = arith.constant 9 : i32
    %116 = vector.broadcast %c9_i32 : i32 to vector<16x128xi32>
    %117 = arith.cmpi slt, %33, %116 : vector<16x128xi32>
    %cst_49 = arith.constant 0.000000e+00 : f32
    %118 = vector.broadcast %cst_49 : f32 to vector<16x128xf32>
    %119 = arith.select %117, %115, %118 : vector<16x128xi1>, vector<16x128xf32>
    %c0_50 = arith.constant 0 : index
    %c0_51 = arith.constant 0 : index
    %120 = vector.load %arg11[%c0_50, %c0_51] : memref<16x128xf32, #tpu.memory_space<vmem>>, vector<16x128xf32>
    tpu.vector_store %arg11[%c0_50, %c0_51], %119 {strides = array<i32>} : memref<16x128xf32, #tpu.memory_space<vmem>>, vector<16x128xf32>,
    return
  }
  func.func @transform_0(%arg0: i32) -> i32 {
    %c0_i32 = arith.constant 0 : i32
    %c0_i32_0 = arith.constant 0 : i32
    return %c0_i32 : i32
  }
  func.func @transform_1(%arg0: i32) -> (i32, i32) {
    %c0_i32 = arith.constant 0 : i32
    %c0_i32_0 = arith.constant 0 : i32
    return %arg0, %c0_i32 : i32, i32
  }
  func.func @transform_2(%arg0: i32) -> (i32, i32) {
    %c0_i32 = arith.constant 0 : i32
    %c0_i32_0 = arith.constant 0 : i32
    %c0_i32_1 = arith.constant 0 : i32
    return %c0_i32, %c0_i32_0 : i32, i32
  }
  func.func @transform_3(%arg0: i32) -> (i32, i32) {
    %c0_i32 = arith.constant 0 : i32
    %c0_i32_0 = arith.constant 0 : i32
    %c0_i32_1 = arith.constant 0 : i32
    return %c0_i32, %c0_i32_0 : i32, i32
  }
  func.func @transform_4(%arg0: i32) -> (i32, i32) {
    %c0_i32 = arith.constant 0 : i32
    %c0_i32_0 = arith.constant 0 : i32
    %c0_i32_1 = arith.constant 0 : i32
    return %c0_i32, %c0_i32_0 : i32, i32
  }
  func.func @transform_5(%arg0: i32) -> (i32, i32) {
    %c0_i32 = arith.constant 0 : i32
    %c0_i32_0 = arith.constant 0 : i32
    %c0_i32_1 = arith.constant 0 : i32
    return %c0_i32, %c0_i32_0 : i32, i32
  }
  func.func @transform_6(%arg0: i32) -> (i32, i32) {
    %c0_i32 = arith.constant 0 : i32
    %c0_i32_0 = arith.constant 0 : i32
    %c0_i32_1 = arith.constant 0 : i32
    return %c0_i32, %c0_i32_0 : i32, i32
  }
  func.func @transform_7(%arg0: i32) -> (i32, i32) {
    %c0_i32 = arith.constant 0 : i32
    %c0_i32_0 = arith.constant 0 : i32
    %c0_i32_1 = arith.constant 0 : i32
    return %c0_i32, %c0_i32_0 : i32, i32
  }
  func.func @transform_8(%arg0: i32) -> (i32, i32) {
    %c0_i32 = arith.constant 0 : i32
    %c0_i32_0 = arith.constant 0 : i32
    return %arg0, %c0_i32 : i32, i32
  }
  func.func @transform_9(%arg0: i32) -> (i32, i32) {
    %c0_i32 = arith.constant 0 : i32
    %c0_i32_0 = arith.constant 0 : i32
    return %arg0, %c0_i32 : i32, i32
  }
  func.func @transform_10(%arg0: i32) -> (i32, i32) {
    %c0_i32 = arith.constant 0 : i32
    %c0_i32_0 = arith.constant 0 : i32
    return %arg0, %c0_i32 : i32, i32
  }
}

</mosaic_0001>

<bundles_post_ra>
// kernel: network_forward.1
= control target key start
LH: loop header
LB: loop body
LE: loop exit
PB: predicated region body
PF: predicated region fallthrough
CT: control target
= control target key end

     0   :  { %16 = vsyncpa [#allocation3], 0  ;;  %s1982_s16 = smov [#allocation2]   ;;  %s2668_s0 = inlined_call_operand.vmem [shape: f32[2], index: 0, kind: input, shape index: {}]   ;;  %s2669_s1 = inlined_call_operand.vmem [shape: bf16[16,1024], index: 1, kind: input, shape index: {}]   ;;  %s2670_s2 = inlined_call_operand.vmem [shape: bf16[1024,128], index: 2, kind: input, shape index: {}]   ;;  %s2671_s3 = inlined_call_operand.vmem [shape: f32[1,128], index: 3, kind: input, shape index: {}]   ;;  %s2672_s4 = inlined_call_operand.vmem [shape: bf16[128,256], index: 4, kind: input, shape index: {}]   ;;  %s2673_s5 = inlined_call_operand.vmem [shape: f32[1,256], index: 5, kind: input, shape index: {}]   ;;  %s2674_s6 = inlined_call_operand.vmem [shape: bf16[256,256], index: 6, kind: input, shape index: {}]   ;;  %s2675_s7 = inlined_call_operand.vmem [shape: f32[1,256], index: 7, kind: input, shape index: {}]   ;;  %s2676_s8 = inlined_call_operand.vmem [shape: f32[16,128], index: 8, kind: output, shape index: {0}]   ;;  %s2677_s9 = inlined_call_operand.vmem [shape: f32[16,128], index: 9, kind: output, shape index: {1}]   ;;  %s2678_s10 = inlined_call_operand.vmem [shape: f32[16,128], index: 10, kind: output, shape index: {2}]  }
   0x1   :  { %s22_s15 = sshll.u32 %s2668_s0, 4  ;;  %s23_s15 = int_to_ptr.vmem [resolvable:$true] %s22_s15 }
   0x2   :  { %25 = dma.vmem_to_smem %s23_s15, 16, %s1982_s16, [#allocation3]  }
   0x3   :  { %1980 = dma.done.wait [#allocation3], 16  }
   0x4   :  { %1981 = vsyncadd [#allocation3], 4294967280 }
   0x5   :  { %44 = sfence }
   0x6   :  { %v1834_v0 = vld [vmem:[%s2670_s2 + $0x38] sm:$0xff]  ;;  %v1833_v4 = vld [vmem:[%s2670_s2 + $0x30] sm:$0xff]  ;;  %v1832_v8 = vld [vmem:[%s2670_s2 + $0x28] sm:$0xff]  ;;  %s1985_s12 = smov 4   ;;  %s1987_s13 = smov 16  }
   0x7   :  { %v1842_v1 = vld [vmem:[%s2670_s2 + $0x78] sm:$0xff]  ;;  %609 = vmatpush.bf16.msra.mxu0 %v1834_v0  ;;  %v1841_v5 = vld [vmem:[%s2670_s2 + $0x70] sm:$0xff]  ;;  %v1840_v9 = vld [vmem:[%s2670_s2 + $0x68] sm:$0xff]  ;;  %s1988_s14 = smov 32   ;;  %s1989_s15 = smov 64  }
   0x8   :  { %v1850_v2 = vld [vmem:[%s2670_s2 + $0xb8] sm:$0xff]  ;;  %623 = vmatpush.bf16.msra.mxu1 %v1842_v1  ;;  %v1849_v6 = vld [vmem:[%s2670_s2 + $0xb0] sm:$0xff]  ;;  %v1848_v10 = vld [vmem:[%s2670_s2 + $0xa8] sm:$0xff]  ;;  %s2639_s18 = sld [smem:[#allocation2 + $0x1]] }
   0x9   :  { %v1858_v3 = vld [vmem:[%s2670_s2 + $0xf8] sm:$0xff]  ;;  %637 = vmatpush.bf16.msra.mxu2 %v1850_v2  ;;  %v1857_v7 = vld [vmem:[%s2670_s2 + $0xf0] sm:$0xff]  ;;  %v1856_v11 = vld [vmem:[%s2670_s2 + $0xe8] sm:$0xff]  ;;  %s2643_s19 = sld [smem:[#allocation2]] }
   0xa   :  { %651 = vmatpush.bf16.msra.mxu3 %v1858_v3  ;;  %v1831_v12 = vld [vmem:[%s2670_s2 + $0x20] sm:$0xff]  ;;  %v1830_v16 = vld [vmem:[%s2670_s2 + $0x18] sm:$0xff]  ;;  %v1829_v20 = vld [vmem:[%s2670_s2 + $0x10] sm:$0xff] }
   0xb   :  { %610 = vmatpush.bf16.msra.mxu0 %v1833_v4  ;;  %v1839_v13 = vld [vmem:[%s2670_s2 + $0x60] sm:$0xff]  ;;  %v1838_v17 = vld [vmem:[%s2670_s2 + $0x58] sm:$0xff]  ;;  %v1837_v21 = vld [vmem:[%s2670_s2 + $0x50] sm:$0xff] }
   0xc   :  { %624 = vmatpush.bf16.msra.mxu1 %v1841_v5  ;;  %v1847_v14 = vld [vmem:[%s2670_s2 + $0xa0] sm:$0xff]  ;;  %v1846_v18 = vld [vmem:[%s2670_s2 + $0x98] sm:$0xff]  ;;  %v1845_v22 = vld [vmem:[%s2670_s2 + $0x90] sm:$0xff] }
   0xd   :  { %638 = vmatpush.bf16.msra.mxu2 %v1849_v6  ;;  %v1855_v15 = vld [vmem:[%s2670_s2 + $0xe0] sm:$0xff]  ;;  %v1854_v19 = vld [vmem:[%s2670_s2 + $0xd8] sm:$0xff]  ;;  %v1853_v23 = vld [vmem:[%s2670_s2 + $0xd0] sm:$0xff] }
   0xe   :  { %652 = vmatpush.bf16.msra.mxu3 %v1857_v7  ;;  %v1828_v24 = vld [vmem:[%s2670_s2 + $0x8] sm:$0xff]  ;;  %v1827_v28 = vld [vmem:[%s2670_s2] sm:$0xff]  ;;  %v1866_v32 = vld [vmem:[%s2670_s2 + $0x138] sm:$0xff] }
   0xf   :  { %611 = vmatpush.bf16.msra.mxu0 %v1832_v8  ;;  %v1836_v25 = vld [vmem:[%s2670_s2 + $0x48] sm:$0xff]  ;;  %v1835_v29 = vld [vmem:[%s2670_s2 + $0x40] sm:$0xff]  ;;  %v1874_v33 = vld [vmem:[%s2670_s2 + $0x178] sm:$0xff] }
  0x10   :  { %625 = vmatpush.bf16.msra.mxu1 %v1840_v9  ;;  %v1844_v26 = vld [vmem:[%s2670_s2 + $0x88] sm:$0xff]  ;;  %v1843_v30 = vld [vmem:[%s2670_s2 + $0x80] sm:$0xff]  ;;  %v1882_v42 = vld [vmem:[%s2670_s2 + $0x1b8] sm:$0xff] }
  0x11   :  { %639 = vmatpush.bf16.msra.mxu2 %v1848_v10  ;;  %v1852_v27 = vld [vmem:[%s2670_s2 + $0xc8] sm:$0xff]  ;;  %v1851_v31 = vld [vmem:[%s2670_s2 + $0xc0] sm:$0xff]  ;;  %v1890_v43 = vld [vmem:[%s2670_s2 + $0x1f8] sm:$0xff] }
  0x12   :  { %653 = vmatpush.bf16.msra.mxu3 %v1856_v11  ;;  %v1348_v34 = vld [vmem:[%s2669_s1 + $0x8] sm:$0xf]  ;;  %v1340_v36 = vld [vmem:[%s2669_s1] sm:$0xf]  ;;  %v1820_v38 = vld [vmem:[%s2669_s1 + $0xc] sm:$0xf] }
  0x13   :  { %612 = vmatpush.bf16.msra.mxu0 %v1831_v12  ;;  %v1824_v35 = vld [vmem:[%s2669_s1 + $0x24] sm:$0xf0]  ;;  %v1823_v37 = vld [vmem:[%s2669_s1 + $0x1c] sm:$0xf0]  ;;  %v1350_v39 = vld [vmem:[%s2669_s1 + $0x28] sm:$0xf0] }
  0x14   :  { %626 = vmatpush.bf16.msra.mxu1 %v1839_v13  ;;  %v1819_v40 = vld [vmem:[%s2669_s1 + $0x4] sm:$0xf]  ;;  %v1349_v44 = vor.u32 %v1824_v35, %v1348_v34  ;;  %v1341_v45 = vor.u32 %v1823_v37, %v1340_v36  ;;  %v1353_v46 = vor.u32 %v1820_v38, %v1350_v39  ;;  %v1865_v48 = vld [vmem:[%s2670_s2 + $0x130] sm:$0xff]  ;;  %v1864_v52 = vld [vmem:[%s2670_s2 + $0x128] sm:$0xff] }
  0x15   :  { %640 = vmatpush.bf16.msra.mxu2 %v1847_v14  ;;  %v1342_v41 = vld [vmem:[%s2669_s1 + $0x20] sm:$0xf0]  ;;  %v1873_v49 = vld [vmem:[%s2670_s2 + $0x170] sm:$0xff]  ;;  %v1872_v53 = vld [vmem:[%s2670_s2 + $0x168] sm:$0xff] }
  0x16   :  { %654 = vmatpush.bf16.msra.mxu3 %v1855_v15  ;;  %v1345_v47 = vor.u32 %v1819_v40, %v1342_v41  ;;  %v1881_v50 = vld [vmem:[%s2670_s2 + $0x1b0] sm:$0xff]  ;;  %v1880_v54 = vld [vmem:[%s2670_s2 + $0x1a8] sm:$0xff]  ;;  %v1863_v56 = vld [vmem:[%s2670_s2 + $0x120] sm:$0xff] }
  0x17   :  { %613 = vmatpush.bf16.msra.mxu0 %v1830_v16  ;;  %v1889_v51 = vld [vmem:[%s2670_s2 + $0x1f0] sm:$0xff]  ;;  %v1888_v55 = vld [vmem:[%s2670_s2 + $0x1e8] sm:$0xff]  ;;  %v1871_v57 = vld [vmem:[%s2670_s2 + $0x160] sm:$0xff] }
  0x18   :  { %627 = vmatpush.bf16.msra.mxu1 %v1838_v17  ;;  %v1879_v58 = vld [vmem:[%s2670_s2 + $0x1a0] sm:$0xff]  ;;  %v1862_v60 = vld [vmem:[%s2670_s2 + $0x118] sm:$0xff]  ;;  %v1861_v0 = vld [vmem:[%s2670_s2 + $0x110] sm:$0xff] }
  0x19   :  { %641 = vmatpush.bf16.msra.mxu2 %v1846_v18  ;;  %v1887_v59 = vld [vmem:[%s2670_s2 + $0x1e0] sm:$0xff]  ;;  %v1870_v61 = vld [vmem:[%s2670_s2 + $0x158] sm:$0xff]  ;;  %v1869_v1 = vld [vmem:[%s2670_s2 + $0x150] sm:$0xff] }
  0x1a   :  { %655 = vmatpush.bf16.msra.mxu3 %v1854_v19  ;;  %v1878_v62 = vld [vmem:[%s2670_s2 + $0x198] sm:$0xff]  ;;  %v1877_v2 = vld [vmem:[%s2670_s2 + $0x190] sm:$0xff]  ;;  %v1860_v4 = vld [vmem:[%s2670_s2 + $0x108] sm:$0xff] }
  0x1b   :  { %614 = vmatpush.bf16.msra.mxu0 %v1829_v20  ;;  %v1886_v63 = vld [vmem:[%s2670_s2 + $0x1d8] sm:$0xff]  ;;  %v1885_v3 = vld [vmem:[%s2670_s2 + $0x1d0] sm:$0xff]  ;;  %v1868_v5 = vld [vmem:[%s2670_s2 + $0x148] sm:$0xff] }
  0x1c   :  { %628 = vmatpush.bf16.msra.mxu1 %v1837_v21  ;;  %v1876_v6 = vld [vmem:[%s2670_s2 + $0x188] sm:$0xff]  ;;  %v1859_v8 = vld [vmem:[%s2670_s2 + $0x100] sm:$0xff]  ;;  %v1356_v12 = vld [vmem:[%s2669_s1 + $0x10] sm:$0xf] }
  0x1d   :  { %642 = vmatpush.bf16.msra.mxu2 %v1845_v22  ;;  %v1884_v7 = vld [vmem:[%s2670_s2 + $0x1c8] sm:$0xff]  ;;  %v1867_v9 = vld [vmem:[%s2670_s2 + $0x140] sm:$0xff]  ;;  %v1825_v13 = vld [vmem:[%s2669_s1 + $0x2c] sm:$0xf0] }
  0x1e   :  { %656 = vmatpush.bf16.msra.mxu3 %v1853_v23  ;;  %v1875_v10 = vld [vmem:[%s2670_s2 + $0x180] sm:$0xff]  ;;  %v1821_v14 = vld [vmem:[%s2669_s1 + $0x14] sm:$0xf]  ;;  %v1364_v16 = vld [vmem:[%s2669_s1 + $0x18] sm:$0xf]  ;;  %v1357_v20 = vor.u32 %v1825_v13, %v1356_v12 }
  0x1f   :  { %615 = vmatpush.bf16.msra.mxu0 %v1828_v24  ;;  %v1883_v11 = vld [vmem:[%s2670_s2 + $0x1c0] sm:$0xff]  ;;  %v1358_v15 = vld [vmem:[%s2669_s1 + $0x30] sm:$0xf0]  ;;  %v1826_v17 = vld [vmem:[%s2669_s1 + $0x34] sm:$0xf0] }
  0x20   :  { %629 = vmatpush.bf16.msra.mxu1 %v1836_v25  ;;  %v1822_v18 = vld [vmem:[%s2669_s1 + $0x1c] sm:$0xf]  ;;  %v1361_v21 = vor.u32 %v1821_v14, %v1358_v15  ;;  %v1365_v22 = vor.u32 %v1826_v17, %v1364_v16  ;;  %v1684_v24 = vld [vmem:[%s2672_s4 + $0x70] sm:$0xf]  ;;  %v1906_v25 = vld [vmem:[%s2672_s4 + $0x74] sm:$0xf0] }
  0x21   :  { %643 = vmatpush.bf16.msra.mxu2 %v1844_v26  ;;  %v1366_v19 = vld [vmem:[%s2669_s1 + $0x38] sm:$0xf0]  ;;  %v1905_v26 = vld [vmem:[%s2672_s4 + $0x74] sm:$0xf]  ;;  %v1668_v36 = vld [vmem:[%s2672_s4 + $0x50] sm:$0xf] }
  0x22   :  { %657 = vmatpush.bf16.msra.mxu3 %v1852_v27  ;;  %v1369_v23 = vor.u32 %v1822_v18, %v1366_v19  ;;  %v1685_v27 = vor.u32 %v1906_v25, %v1684_v24  ;;  %v1902_v37 = vld [vmem:[%s2672_s4 + $0x54] sm:$0xf0]  ;;  %v1901_v38 = vld [vmem:[%s2672_s4 + $0x54] sm:$0xf]  ;;  %v1670_v40 = vld [vmem:[%s2672_s4 + $0x58] sm:$0xf0] }
  0x23   :  { %616 = vmatpush.bf16.msra.mxu0 %v1827_v28  ;;  %v1686_v28 = vld [vmem:[%s2672_s4 + $0x78] sm:$0xf0]  ;;  %v1669_v39 = vor.u32 %v1902_v37, %v1668_v36  ;;  %v1673_v41 = vor.u32 %v1901_v38, %v1670_v40  ;;  %v1748_v15 = vld [vmem:[%s2674_s6 + $0x70] sm:$0xf]  ;;  %v1922_v16 = vld [vmem:[%s2674_s6 + $0x74] sm:$0xf0] }
  0x24   :  { %630 = vmatpush.bf16.msra.mxu1 %v1835_v29  ;;  %v1676_v29 = vld [vmem:[%s2672_s4 + $0x60] sm:$0xf]  ;;  %v1812_v17 = vld [vmem:[%s2674_s6 + $0xf0] sm:$0xf]  ;;  %v1749_v18 = vor.u32 %v1922_v16, %v1748_v15  ;;  %v1938_v19 = vld [vmem:[%s2674_s6 + $0xf4] sm:$0xf0] }
  0x25   :  { %644 = vmatpush.bf16.msra.mxu2 %v1843_v30  ;;  %v1904_v30 = vld [vmem:[%s2672_s4 + $0x64] sm:$0xf0]  ;;  %v1937_v24 = vld [vmem:[%s2674_s6 + $0xf4] sm:$0xf]  ;;  %v1814_v25 = vld [vmem:[%s2674_s6 + $0xf8] sm:$0xf0] }
  0x26   :  { %658 = vmatpush.bf16.msra.mxu3 %v1851_v31  ;;  %617 = vmatmul.bf16.vlgmr.msra.gmra.mxu0 %v1341_v45  ;;  %v1689_v31 = vor.u32 %v1905_v26, %v1686_v28  ;;  %v1677_v34 = vor.u32 %v1904_v30, %v1676_v29  ;;  %v1740_v26 = vld [vmem:[%s2674_s6 + $0x60] sm:$0xf]  ;;  %v1817_v29 = vor.u32 %v1937_v24, %v1814_v25  ;;  %v1920_v30 = vld [vmem:[%s2674_s6 + $0x64] sm:$0xf0]  ;;  %v1919_v36 = vld [vmem:[%s2674_s6 + $0x64] sm:$0xf] }
  0x27   :  { %665 = vmatpush.bf16.msrb.mxu0 %v1866_v32  ;;  %631 = vmatmul.bf16.vlgmr.msra.gmra.mxu1 %v1345_v47  ;;  %v1903_v32 = vld [vmem:[%s2672_s4 + $0x64] sm:$0xf]  ;;  %v1742_v37 = vld [vmem:[%s2674_s6 + $0x68] sm:$0xf0]  ;;  %s1984_s1 = smov 2  }
  0x28   :  { %679 = vmatpush.bf16.msrb.mxu1 %v1874_v33  ;;  %645 = vmatmul.bf16.vlgmr.msra.gmra.mxu2 %v1349_v44  ;;  %v1678_v33 = vld [vmem:[%s2672_s4 + $0x68] sm:$0xf0]  ;;  %v1899_v44 = vld [vmem:[%s2672_s4 + $0x44] sm:$0xf] }
  0x29   :  { %693 = vmatpush.bf16.msrb.mxu2 %v1882_v42  ;;  %659 = vmatmul.bf16.vlgmr.msra.gmra.mxu3 %v1353_v46  ;;  %v1681_v35 = vor.u32 %v1903_v32, %v1678_v33  ;;  %v1660_v42 = vld [vmem:[%s2672_s4 + $0x40] sm:$0xf]  ;;  %v1662_v46 = vld [vmem:[%s2672_s4 + $0x48] sm:$0xf0]  ;;  %v1936_v32 = vld [vmem:[%s2674_s6 + $0xe4] sm:$0xf0] }
  0x2a   :  { %707 = vmatpush.bf16.msrb.mxu3 %v1890_v43  ;;  %v1900_v43 = vld [vmem:[%s2672_s4 + $0x44] sm:$0xf0]  ;;  %v1665_v47 = vor.u32 %v1899_v44, %v1662_v46  ;;  %v1935_v38 = vld [vmem:[%s2674_s6 + $0xe4] sm:$0xf]  ;;  %v1806_v40 = vld [vmem:[%s2674_s6 + $0xe8] sm:$0xf0] }
  0x2b   :  { %666 = vmatpush.bf16.msrb.mxu0 %v1865_v48  ;;  %v1661_v45 = vor.u32 %v1900_v43, %v1660_v42  ;;  %v1652_v48 = vld [vmem:[%s2672_s4 + $0x30] sm:$0xf]  ;;  %v1918_v42 = vld [vmem:[%s2674_s6 + $0x54] sm:$0xf0]  ;;  %v1809_v43 = vor.u32 %v1935_v38, %v1806_v40  ;;  %v1917_v46 = vld [vmem:[%s2674_s6 + $0x54] sm:$0xf] }
  0x2c   :  { %680 = vmatpush.bf16.msrb.mxu1 %v1873_v49  ;;  %v1898_v49 = vld [vmem:[%s2672_s4 + $0x34] sm:$0xf0]  ;;  %v1796_v44 = vld [vmem:[%s2674_s6 + $0xd0] sm:$0xf]  ;;  %v1782_v38 = vld [vmem:[%s2674_s6 + $0xb8] sm:$0xf0] }
  0x2d   :  { %694 = vmatpush.bf16.msrb.mxu2 %v1881_v50  ;;  %v1897_v50 = vld [vmem:[%s2672_s4 + $0x34] sm:$0xf]  ;;  %v1708_v40 = vld [vmem:[%s2674_s6 + $0x20] sm:$0xf] }
  0x2e   :  { %708 = vmatpush.bf16.msrb.mxu3 %v1889_v51  ;;  %v1653_v51 = vor.u32 %v1898_v49, %v1652_v48 }
  0x2f   :  { %667 = vmatpush.bf16.msrb.mxu0 %v1864_v52  ;;  %v1654_v52 = vld [vmem:[%s2672_s4 + $0x38] sm:$0xf0] }
  0x30   :  { %681 = vmatpush.bf16.msrb.mxu1 %v1872_v53  ;;  %v1657_v53 = vor.u32 %v1897_v50, %v1654_v52  ;;  %v1933_v52 = vld [vmem:[%s2674_s6 + $0xd4] sm:$0xf] }
  0x31   :  { %695 = vmatpush.bf16.msrb.mxu2 %v1880_v54  ;;  %v1644_v54 = vld [vmem:[%s2672_s4 + $0x20] sm:$0xf] }
  0x32   :  { %709 = vmatpush.bf16.msrb.mxu3 %v1888_v55  ;;  %v1896_v55 = vld [vmem:[%s2672_s4 + $0x24] sm:$0xf0] }
  0x33   :  { %668 = vmatpush.bf16.msrb.mxu0 %v1863_v56  ;;  %v1895_v56 = vld [vmem:[%s2672_s4 + $0x24] sm:$0xf] }
  0x34   :  { %682 = vmatpush.bf16.msrb.mxu1 %v1871_v57  ;;  %v1645_v57 = vor.u32 %v1896_v55, %v1644_v54 }
  0x35   :  { %696 = vmatpush.bf16.msrb.mxu2 %v1879_v58  ;;  %v1646_v58 = vld [vmem:[%s2672_s4 + $0x28] sm:$0xf0] }
  0x36   :  { %710 = vmatpush.bf16.msrb.mxu3 %v1887_v59  ;;  %v1649_v59 = vor.u32 %v1895_v56, %v1646_v58  ;;  %v1724_v58 = vld [vmem:[%s2674_s6 + $0x40] sm:$0xf] }
  0x37   :  { %669 = vmatpush.bf16.msrb.mxu0 %v1862_v60 }
  0x38   :  { %683 = vmatpush.bf16.msrb.mxu1 %v1870_v61  ;;  %v1636_v61 = vld [vmem:[%s2672_s4 + $0x10] sm:$0xf] }
  0x39   :  { %697 = vmatpush.bf16.msrb.mxu2 %v1878_v62  ;;  %v1894_v62 = vld [vmem:[%s2672_s4 + $0x14] sm:$0xf0] }
  0x3a   :  { %711 = vmatpush.bf16.msrb.mxu3 %v1886_v63  ;;  %v1893_v63 = vld [vmem:[%s2672_s4 + $0x14] sm:$0xf] }
  0x3b   :  { %670 = vmatpush.bf16.msrb.mxu0 %v1861_v0  ;;  %v1637_v0 = vor.u32 %v1894_v62, %v1636_v61  ;;  %v1932_v62 = vld [vmem:[%s2674_s6 + $0xc4] sm:$0xf0] }
  0x3c   :  { %684 = vmatpush.bf16.msrb.mxu1 %v1869_v1  ;;  %v1638_v1 = vld [vmem:[%s2672_s4 + $0x18] sm:$0xf0] }
  0x3d   :  { %698 = vmatpush.bf16.msrb.mxu2 %v1877_v2  ;;  %v1641_v2 = vor.u32 %v1893_v63, %v1638_v1  ;;  %v1915_v63 = vld [vmem:[%s2674_s6 + $0x44] sm:$0xf] }
  0x3e   :  { %712 = vmatpush.bf16.msrb.mxu3 %v1885_v3  ;;  %v1931_v1 = vld [vmem:[%s2674_s6 + $0xc4] sm:$0xf] }
  0x3f   :  { %671 = vmatpush.bf16.msrb.mxu0 %v1860_v4  ;;  %v1628_v4 = vld [vmem:[%s2672_s4] sm:$0xf] }
  0x40   :  { %685 = vmatpush.bf16.msrb.mxu1 %v1868_v5  ;;  %v1892_v5 = vld [vmem:[%s2672_s4 + $0x4] sm:$0xf0] }
  0x41   :  { %699 = vmatpush.bf16.msrb.mxu2 %v1876_v6  ;;  %v1891_v6 = vld [vmem:[%s2672_s4 + $0x4] sm:$0xf] }
  0x42   :  { %713 = vmatpush.bf16.msrb.mxu3 %v1884_v7  ;;  %v1947_v7 = vld [vmem:[%s2671_s3] ss:$0 sm:$0xff] }
  0x43   :  { %672 = vmatpush.bf16.msrb.mxu0 %v1859_v8  ;;  %v1629_v8 = vor.u32 %v1892_v5, %v1628_v4 }
  0x44   :  { %686 = vmatpush.bf16.msrb.mxu1 %v1867_v9  ;;  %v1630_v9 = vld [vmem:[%s2672_s4 + $0x8] sm:$0xf0] }
  0x45   :  { %700 = vmatpush.bf16.msrb.mxu2 %v1875_v10  ;;  %v1633_v10 = vor.u32 %v1891_v6, %v1630_v9 }
  0x46   :  { %714 = vmatpush.bf16.msrb.mxu3 %v1883_v11  ;;  %673 = vmatmul.bf16.vlgmr.msrb.gmra.mxu0 %v1357_v20  ;;  %v1921_v20 = vld [vmem:[%s2674_s6 + $0x74] sm:$0xf] }
  0x47   :  { %687 = vmatmul.bf16.vlgmr.msrb.gmra.mxu1 %v1361_v21  ;;  %826 = vmatpush.bf16.msra.mxu0 %v1685_v27  ;;  %v1750_v21 = vld [vmem:[%s2674_s6 + $0x78] sm:$0xf0] }
  0x48   :  { %701 = vmatmul.bf16.vlgmr.msrb.gmra.mxu2 %v1365_v22  ;;  %840 = vmatpush.bf16.msra.mxu1 %v1689_v31  ;;  %v1813_v22 = vor.u32 %v1938_v19, %v1812_v17  ;;  %v1804_v31 = vld [vmem:[%s2674_s6 + $0xe0] sm:$0xf] }
  0x49   :  { %715 = vmatmul.bf16.vlgmr.msrb.gmra.mxu3 %v1369_v23  ;;  %v1753_v23 = vor.u32 %v1921_v20, %v1750_v21  ;;  %1058 = vmatpush.bf16.msra.mxu2 %v1749_v18 }
  0x4a   :  { %1072 = vmatpush.bf16.msra.mxu3 %v1813_v22 }
  0x4b   :  { %827 = vmatpush.bf16.msra.mxu0 %v1677_v34  ;;  %v1741_v34 = vor.u32 %v1920_v30, %v1740_v26  ;;  %v1780_v30 = vld [vmem:[%s2674_s6 + $0xb0] sm:$0xf] }
  0x4c   :  { %841 = vmatpush.bf16.msra.mxu1 %v1681_v35  ;;  %v1805_v35 = vor.u32 %v1936_v32, %v1804_v31  ;;  %v1930_v32 = vld [vmem:[%s2674_s6 + $0xb4] sm:$0xf0] }
  0x4d   :  { %1059 = vmatpush.bf16.msra.mxu2 %v1741_v34  ;;  %v1718_v34 = vld [vmem:[%s2674_s6 + $0x38] sm:$0xf0] }
  0x4e   :  { %1073 = vmatpush.bf16.msra.mxu3 %v1805_v35  ;;  %v1781_v35 = vor.u32 %v1930_v32, %v1780_v30  ;;  %v1146_v30 = vlaneseq }
  0x4f   :  { %828 = vmatpush.bf16.msra.mxu0 %v1669_v39  ;;  %v1745_v39 = vor.u32 %v1919_v36, %v1742_v37  ;;  %v1929_v37 = vld [vmem:[%s2674_s6 + $0xb4] sm:$0xf] }
  0x50   :  { %842 = vmatpush.bf16.msra.mxu1 %v1673_v41  ;;  %v1732_v41 = vld [vmem:[%s2674_s6 + $0x50] sm:$0xf]  ;;  %v2591_v32 = vand.u32 127, %v1146_v30 }
  0x51   :  { %v1733_v50 = vor.u32 %v1918_v42, %v1732_v41  ;;  %v1912_v41 = vld [vmem:[%s2674_s6 + $0x24] sm:$0xf0]  ;;  %v1772_v42 = vld [vmem:[%s2674_s6 + $0xa0] sm:$0xf] }
  0x52   :  { %vm1148_vm0 = vcmp.lt.s32.totalorder %v2591_v32, 10  ;;  %vm1203_vm9 = vcmp.ge.s32.totalorder %v2591_v32, 1  ;;  %vm1212_vm10 = vcmp.ge.s32.totalorder %v2591_v32, 2  ;;  %vm1221_vm11 = vcmp.ge.s32.totalorder %v2591_v32, 4 }
  0x53   :  { %829 = vmatpush.bf16.msra.mxu0 %v1661_v45  ;;  %v1934_v45 = vld [vmem:[%s2674_s6 + $0xd4] sm:$0xf0]  ;;  %1060 = vmatpush.bf16.msra.mxu2 %v1733_v50  ;;  %v1774_v50 = vld [vmem:[%s2674_s6 + $0xa8] sm:$0xf0]  ;;  %vm1230_vm12 = vcmp.ge.s32.totalorder %v2591_v32, 8  ;;  %vm1239_vm13 = vcmp.ge.s32.totalorder %v2591_v32, 16 }
  0x54   :  { %843 = vmatpush.bf16.msra.mxu1 %v1665_v47  ;;  %v1797_v56 = vor.u32 %v1934_v45, %v1796_v44  ;;  %v1928_v44 = vld [vmem:[%s2674_s6 + $0xa4] sm:$0xf0]  ;;  %v1911_v45 = vld [vmem:[%s2674_s6 + $0x24] sm:$0xf]  ;;  %vm1248_vm14 = vcmp.ge.s32.totalorder %v2591_v32, 32 }
  0x56   :  { %1074 = vmatpush.bf16.msra.mxu3 %v1797_v56  ;;  %v1926_v56 = vld [vmem:[%s2674_s6 + $0x94] sm:$0xf0] }
  0x57   :  { %830 = vmatpush.bf16.msra.mxu0 %v1653_v51  ;;  %v1734_v51 = vld [vmem:[%s2674_s6 + $0x58] sm:$0xf0] }
  0x58   :  { %844 = vmatpush.bf16.msra.mxu1 %v1657_v53  ;;  %v1798_v53 = vld [vmem:[%s2674_s6 + $0xd8] sm:$0xf0] }
  0x59   :  { %v1801_v61 = vor.u32 %v1933_v52, %v1798_v53  ;;  %v1700_v52 = vld [vmem:[%s2674_s6 + $0x10] sm:$0xf]  ;;  %v1910_v53 = vld [vmem:[%s2674_s6 + $0x14] sm:$0xf0] }
  0x5b   :  { %831 = vmatpush.bf16.msra.mxu0 %v1645_v57  ;;  %v1737_v57 = vor.u32 %v1917_v46, %v1734_v51  ;;  %v1710_v46 = vld [vmem:[%s2674_s6 + $0x28] sm:$0xf0] }
  0x5c   :  { %845 = vmatpush.bf16.msra.mxu1 %v1649_v59  ;;  %v1916_v59 = vld [vmem:[%s2674_s6 + $0x44] sm:$0xf0] }
  0x5d   :  { %v1725_v5 = vor.u32 %v1916_v59, %v1724_v58  ;;  %v1702_v58 = vld [vmem:[%s2674_s6 + $0x18] sm:$0xf0] }
  0x5f   :  { %832 = vmatpush.bf16.msra.mxu0 %v1637_v0  ;;  %v1726_v0 = vld [vmem:[%s2674_s6 + $0x48] sm:$0xf0]  ;;  %1061 = vmatpush.bf16.msra.mxu2 %v1725_v5  ;;  %v1907_v5 = vld [vmem:[%s2674_s6 + $0x4] sm:$0xf] }
  0x60   :  { %846 = vmatpush.bf16.msra.mxu1 %v1641_v2  ;;  %v1790_v2 = vld [vmem:[%s2674_s6 + $0xc8] sm:$0xf0] }
  0x61   :  { %v1793_v9 = vor.u32 %v1931_v1, %v1790_v2  ;;  %v1908_v1 = vld [vmem:[%s2674_s6 + $0x4] sm:$0xf0]  ;;  %v1756_v2 = vld [vmem:[%s2674_s6 + $0x80] sm:$0xf] }
  0x63   :  { %833 = vmatpush.bf16.msra.mxu0 %v1629_v8  ;;  %v1729_v8 = vor.u32 %v1915_v63, %v1726_v0  ;;  %v1692_v0 = vld [vmem:[%s2674_s6] sm:$0xf] }
  0x64   :  { %847 = vmatpush.bf16.msra.mxu1 %v1633_v10 }
  0x67   :  { %1086 = vmatpush.bf16.msrb.mxu0 %v1753_v23 }
  0x68   :  { %1100 = vmatpush.bf16.msrb.mxu1 %v1817_v29  ;;  %v1914_v29 = vld [vmem:[%s2674_s6 + $0x34] sm:$0xf0] }
  0x6b   :  { %1087 = vmatpush.bf16.msrb.mxu0 %v1745_v39  ;;  %v1785_v39 = vor.u32 %v1929_v37, %v1782_v38 }
  0x6c   :  { %1101 = vmatpush.bf16.msrb.mxu1 %v1809_v43  ;;  %v1709_v43 = vor.u32 %v1912_v41, %v1708_v40 }
  0x6f   :  { %1088 = vmatpush.bf16.msrb.mxu0 %v1737_v57  ;;  %v1909_v57 = vld [vmem:[%s2674_s6 + $0x14] sm:$0xf] }
  0x70   :  { %1102 = vmatpush.bf16.msrb.mxu1 %v1801_v61  ;;  %v1925_v61 = vld [vmem:[%s2674_s6 + $0x94] sm:$0xf] }
  0x73   :  { %1089 = vmatpush.bf16.msrb.mxu0 %v1729_v8 }
  0x74   :  { %1103 = vmatpush.bf16.msrb.mxu1 %v1793_v9  ;;  %v1923_v9 = vld [vmem:[%s2674_s6 + $0x84] sm:$0xf] }
  0x78   :  { %1104 = vmatpush.bf16.msrb.mxu1 %v1785_v39 }
  0xa3   :  { %v618_v60 = vpop.f32.mrf.mxu0 }
  0xa4   :  { %v632_v3 = vpop.f32.mrf.mxu1  ;;  %v619_v13 = vadd.f32 %v1947_v7, %v618_v60  ;;  %v1788_v60 = vld [vmem:[%s2674_s6 + $0xc0] sm:$0xf] }
  0xa6   :  { %v633_v27 = vadd.f32 %v632_v3, %v619_v13 }
  0xab   :  { %v646_v11 = vpop.f32.mrf.mxu2  ;;  %v620_v14 = vpop.f32.mrf.mxu0 }
  0xac   :  { %v2387_v12 = vpop.f32.mrf.mxu3  ;;  %v634_v28 = vpop.f32.mrf.mxu1  ;;  %v621_v33 = vadd.f32 %v1947_v7, %v620_v14  ;;  %v647_v47 = vadd.f32 %v646_v11, %v633_v27  ;;  %v1789_v7 = vor.u32 %v1932_v62, %v1788_v60  ;;  %v1705_v60 = vor.u32 %v1909_v57, %v1702_v58  ;;  %v1766_v62 = vld [vmem:[%s2674_s6 + $0x98] sm:$0xf0] }
  0xad   :  { %v1769_v63 = vor.u32 %v1925_v61, %v1766_v62 }
  0xae   :  { %v635_v54 = vadd.f32 %v634_v28, %v621_v33  ;;  %v661_v3 = vadd.f32 %v2387_v12, %v647_v47  ;;  %1075 = vmatpush.bf16.msra.mxu3 %v1789_v7  ;;  %v1716_v28 = vld [vmem:[%s2674_s6 + $0x30] sm:$0xf]  ;;  %v1913_v33 = vld [vmem:[%s2674_s6 + $0x34] sm:$0xf]  ;;  %v1773_v47 = vor.u32 %v1928_v44, %v1772_v42 }
  0xaf   :  { %v1717_v31 = vor.u32 %v1914_v29, %v1716_v28  ;;  %v1721_v36 = vor.u32 %v1913_v33, %v1718_v34  ;;  %v2588_v29 = vld [vmem:[%s2675_s7] sm:$0x3]  ;;  %s1983_s7 = smov 1  }
  0xb1   :  { %1062 = vmatpush.bf16.msra.mxu2 %v1717_v31  ;;  %1090 = vmatpush.bf16.msrb.mxu0 %v1721_v36  ;;  %v895_v31 = vperm.slane %v2588_v29, 1 }
  0xb2   :  { %1076 = vmatpush.bf16.msra.mxu3 %v1781_v35 }
  0xb3   :  { %v648_v48 = vpop.f32.mrf.mxu2 }
  0xb4   :  { %v662_v49 = vpop.f32.mrf.mxu3  ;;  %v649_v6 = vadd.f32 %v648_v48, %v635_v54  ;;  %v1713_v48 = vor.u32 %v1911_v45, %v1710_v46  ;;  %v1764_v54 = vld [vmem:[%s2674_s6 + $0x90] sm:$0xf] }
  0xb5   :  { %1063 = vmatpush.bf16.msra.mxu2 %v1709_v43  ;;  %v1765_v59 = vor.u32 %v1926_v56, %v1764_v54 }
  0xb6   :  { %v663_v14 = vadd.f32 %v662_v49, %v649_v6  ;;  %v1927_v49 = vld [vmem:[%s2674_s6 + $0xa4] sm:$0xf]  ;;  %1077 = vmatpush.bf16.msra.mxu3 %v1773_v47  ;;  %1091 = vmatpush.bf16.msrb.mxu0 %v1713_v48  ;;  %v1694_v6 = vld [vmem:[%s2674_s6 + $0x8] sm:$0xf0] }
  0xb7   :  { %v1777_v51 = vor.u32 %v1927_v49, %v1774_v50  ;;  %v1697_v8 = vor.u32 %v1907_v5, %v1694_v6 }
  0xb9   :  { %1105 = vmatpush.bf16.msrb.mxu1 %v1777_v51 }
  0xba   :  { %1078 = vmatpush.bf16.msra.mxu3 %v1765_v59  ;;  %1092 = vmatpush.bf16.msrb.mxu0 %v1705_v60 }
  0xbd   :  { %1106 = vmatpush.bf16.msrb.mxu1 %v1769_v63 }
  0xbe   :  { %1093 = vmatpush.bf16.msrb.mxu0 %v1697_v8 }
  0xc3   :  { %v674_v55 = vpop.f32.mrf.mxu0 }
  0xc4   :  { %v688_v4 = vpop.f32.mrf.mxu1  ;;  %v675_v10 = vadd.f32 %v674_v55, %v661_v3  ;;  %v1701_v55 = vor.u32 %v1910_v53, %v1700_v52  ;;  %v1693_v3 = vor.u32 %v1908_v1, %v1692_v0 }
  0xc6   :  { %v689_v12 = vadd.f32 %v688_v4, %v675_v10  ;;  %1064 = vmatpush.bf16.msra.mxu2 %v1701_v55  ;;  %v1924_v4 = vld [vmem:[%s2674_s6 + $0x84] sm:$0xf0]  ;;  %v1758_v10 = vld [vmem:[%s2674_s6 + $0x88] sm:$0xf0] }
  0xc7   :  { %v1757_v7 = vor.u32 %v1924_v4, %v1756_v2 }
  0xc9   :  { %1079 = vmatpush.bf16.msra.mxu3 %v1757_v7 }
  0xca   :  { %1065 = vmatpush.bf16.msra.mxu2 %v1693_v3 }
  0xcb   :  { %v702_v11 = vpop.f32.mrf.mxu2  ;;  %v676_v15 = vpop.f32.mrf.mxu0 }
  0xcc   :  { %v716_v13 = vpop.f32.mrf.mxu3  ;;  %v677_v16 = vadd.f32 %v676_v15, %v663_v14  ;;  %v703_v17 = vadd.f32 %v702_v11, %v689_v12  ;;  %v690_v18 = vpop.f32.mrf.mxu1  ;;  %v1761_v11 = vor.u32 %v1923_v9, %v1758_v10 }
  0xce   :  { %v691_v19 = vadd.f32 %v690_v18, %v677_v16  ;;  %v717_v21 = vadd.f32 %v716_v13, %v703_v17  ;;  %1107 = vmatpush.bf16.msrb.mxu1 %v1761_v11  ;;  %v740_v13 = vld [vmem:[%s2673_s5] sm:$0x3] }
  0xcf   :  { %v742_v12 = vperm.slane %v740_v13, 0  ;;  %v743_v16 = vperm.slane %v740_v13, 1 }
  0xd0   :  { %v721_v25 = vmax.f32 %v717_v21, 0.0 }
  0xd3   :  { %v704_v20 = vpop.f32.mrf.mxu2 }
  0xd4   :  { %v705_v22 = vadd.f32 %v704_v20, %v691_v19  ;;  %v718_v23 = vpop.f32.mrf.mxu3 }
  0xd6   :  { %v719_v24 = vadd.f32 %v718_v23, %v705_v22 }
  0xd8   :  { %v722_v26 = vmax.f32 %v719_v24, 0.0 }
  0xda   :  { %v723_v27 = vpack.c.bf16 %v722_v26, %v721_v25 }
  0xdc   :  { %834 = vmatmul.bf16.vlgmr.msra.gmra.mxu0 %v723_v27  ;;  %848 = vmatmul.bf16.vlgmr.msra.gmra.mxu1 %v723_v27 }
 0x159   :  { %v835_v14 = vpop.f32.mrf.mxu0  ;;  %v849_v15 = vpop.f32.mrf.mxu1 }
 0x15a   :  { %v836_v17 = vadd.f32 %v835_v14, %v742_v12  ;;  %v850_v18 = vadd.f32 %v849_v15, %v743_v16 }
 0x15c   :  { %v854_v23 = vmax.f32 %v836_v17, 0.0  ;;  %v855_v24 = vmax.f32 %v850_v18, 0.0 }
 0x161   :  { %v837_v19 = vpop.f32.mrf.mxu0  ;;  %v851_v20 = vpop.f32.mrf.mxu1 }
 0x162   :  { %v838_v21 = vadd.f32 %v837_v19, %v742_v12  ;;  %v852_v22 = vadd.f32 %v851_v20, %v743_v16 }
 0x164   :  { %v856_v25 = vmax.f32 %v838_v21, 0.0  ;;  %v857_v26 = vmax.f32 %v852_v22, 0.0 }
 0x166   :  { %v858_v27 = vpack.c.bf16 %v856_v25, %v854_v23  ;;  %v859_v28 = vpack.c.bf16 %v857_v26, %v855_v24 }
 0x168   :  { %1066 = vmatmul.bf16.vlgmr.msra.gmra.mxu2 %v858_v27  ;;  %1080 = vmatmul.bf16.vlgmr.msra.gmra.mxu3 %v859_v28 }
 0x169   :  { %1094 = vmatmul.bf16.vlgmr.msrb.gmra.mxu0 %v858_v27  ;;  %1108 = vmatmul.bf16.vlgmr.msrb.gmra.mxu1 %v859_v28 }
 0x1e6   :  { %v1095_v33 = vpop.f32.mrf.mxu0  ;;  %v1109_v34 = vpop.f32.mrf.mxu1 }
 0x1e7   :  { %v1096_v35 = vadd.f32 %v1095_v33, %v895_v31 }
 0x1e9   :  { %v1110_v36 = vadd.f32 %v1109_v34, %v1096_v35 }
 0x1eb   :  { %v1149_v37 = vsel %vm1148_vm0, %v1110_v36, -1e+30 }
 0x1ec   :  { %1151 = vmax.xlane.f32.xlu0 %v1149_v37 }
 0x1ee   :  { %v1097_v38 = vpop.f32.mrf.mxu0  ;;  %v1111_v40 = vpop.f32.mrf.mxu1 }
 0x1ef   :  { %v1098_v39 = vadd.f32 %v1097_v38, %v895_v31 }
 0x1f1   :  { %v1112_v41 = vadd.f32 %v1111_v40, %v1098_v39 }
 0x1f3   :  { %v1150_v42 = vsel %vm1148_vm0, %v1112_v41, -1e+30 }
 0x1f4   :  { %1153 = vmax.xlane.f32.xlu0 %v1150_v42 }
 0x25f   :  { %v1152_v43 = vpop.xlane.xlu0 %1151 }
 0x260   :  { %v1155_v44 = vsub.f32 %v1149_v37, %v1152_v43 }
 0x262   :  { %v1157_v45 = vmul.f32 1.442695, %v1155_v44 }
 0x264   :  { %1948 = vpow2.f32 %v1157_v45  ;;  %v894_v45 = vperm.slane %v2588_v29, 0 }
 0x267   :  { %v1154_v46 = vpop.xlane.xlu0 %1153 }
 0x268   :  { %v1156_v47 = vsub.f32 %v1150_v42, %v1154_v46  ;;  %v1067_v46 = vpop.f32.mrf.mxu2 }
 0x26a   :  { %v1949_v48 = vpop.eup %1948  ;;  %v1159_v49 = vmul.f32 1.442695, %v1156_v47  ;;  %v1068_v47 = vadd.f32 %v1067_v46, %v894_v45 }
 0x26b   :  { %1161 = vadd.xlane.f32.xlu1 %v1949_v48 }
 0x26c   :  { %1950 = vpow2.f32 %v1159_v49 }
 0x272   :  { %v1951_v50 = vpop.eup %1950 }
 0x273   :  { %1163 = vadd.xlane.f32.xlu1 %v1951_v50 }
 0x2de   :  { %v1162_v51 = vpop.xlane.xlu1 %1161 }
 0x2df   :  { %1952 = vrcp.f32 %v1162_v51  ;;  %v1176_v56 = vand.u32 2147483648, %v1162_v51  ;;  %v1174_v58 = vand.u32 2147483647, %v1162_v51  ;;  %vm1170_vm2 = vweird.f32 %v1162_v51 }
 0x2e1   :  { %v1177_v61 = vor.u32 1.1754944e-38, %v1176_v56  ;;  %vm1175_vm4 = vcmp.eq.f32.partialorder %v1174_v58, 8.507059e+37 }
 0x2e5   :  { %v1953_v52 = vpop.eup %1952 }
 0x2e6   :  { %v1166_v53 = vmul.f32 %v1953_v52, %v1162_v51  ;;  %v1164_v54 = vpop.xlane.xlu1 %1163  ;;  %vm1171_vm1 = vweird.f32 %v1953_v52 }
 0x2e7   :  { %1954 = vrcp.f32 %v1164_v54  ;;  %vm1172_vm3 = vmor %vm1170_vm2, %vm1171_vm1  ;;  %v1191_v3 = vand.u32 2147483648, %v1164_v54  ;;  %v1189_v5 = vand.u32 2147483647, %v1164_v54  ;;  %vm1185_vm6 = vweird.f32 %v1164_v54 }
 0x2e8   :  { %v1167_v55 = vsub.f32 1.0, %v1166_v53  ;;  %vm1257_vm1 = vcmp.ge.s32.totalorder %v2591_v32, 64 }
 0x2e9   :  { %v1192_v8 = vor.u32 1.1754944e-38, %v1191_v3  ;;  %vm1190_vm8 = vcmp.eq.f32.partialorder %v1189_v5, 8.507059e+37 }
 0x2ea   :  { %v1168_v57 = vmul.f32 %v1953_v52, %v1167_v55  ;;  %v1069_v55 = vpop.f32.mrf.mxu2 }
 0x2eb   :  { %v1070_v58 = vadd.f32 %v1069_v55, %v894_v45 }
 0x2ec   :  { %v1169_v59 = vadd.f32 %v1953_v52, %v1168_v57 }
 0x2ed   :  { %v1955_v60 = vpop.eup %1954 }
 0x2ee   :  { %v1181_v62 = vmul.f32 %v1955_v60, %v1164_v54  ;;  %v1173_v63 = vsel %vm1172_vm3, %v1953_v52, %v1169_v59  ;;  %vm1186_vm5 = vweird.f32 %v1955_v60 }
 0x2ef   :  { %v1178_v0 = vsel %vm1175_vm4, %v1177_v61, %v1173_v63  ;;  %vm1187_vm7 = vmor %vm1185_vm6, %vm1186_vm5 }
 0x2f0   :  { %v1182_v1 = vsub.f32 1.0, %v1181_v62  ;;  %v1179_v2 = vmul.f32 %v1949_v48, %v1178_v0  ;;  %v1081_v48 = vpop.f32.mrf.mxu3 }
 0x2f1   :  { %v1082_v49 = vadd.f32 %v1081_v48, %v1068_v47 }
 0x2f2   :  { %v1183_v4 = vmul.f32 %v1955_v60, %v1182_v1  ;;  %v2600_v6 = vsel %vm1148_vm0, %v1179_v2, 0.0 }
 0x2f3   :  { %1199 = vrot.lane.b32.xlu2 %v2600_v6, %s1983_s7  ;;  %1197 = vst [vmem:[%s2677_s9] sm:$0xff] %v2600_v6 }
 0x2f4   :  { %v1184_v7 = vadd.f32 %v1955_v60, %v1183_v4 }
 0x2f6   :  { %v1188_v9 = vsel %vm1187_vm7, %v1955_v60, %v1184_v7 }
 0x2f7   :  { %v1193_v10 = vsel %vm1190_vm8, %v1192_v8, %v1188_v9 }
 0x2f8   :  { %v1194_v11 = vmul.f32 %v1951_v50, %v1193_v10  ;;  %v1114_v50 = vmul.f32 %v1082_v49, %v1082_v49  ;;  %v1083_v29 = vpop.f32.mrf.mxu3 }
 0x2f9   :  { %v2625_v59 = vadd.f32 %v1083_v29, %v1070_v58 }
 0x2fa   :  { %v2609_v13 = vsel %vm1148_vm0, %v1194_v11, 0.0 }
 0x2fb   :  { %1201 = vrot.lane.b32.xlu2 %v2609_v13, %s1983_s7  ;;  %1198 = vst [vmem:[%s2677_s9 + $0x8] sm:$0xff] %v2609_v13  ;;  %s1986_s9 = smov 8   ;;  %v1115_v60 = vmul.f32 %v2625_v59, %v2625_v59 }
 0x34d   :  { %v1200_v14 = vpop.permute.xlu2 %1199 }
 0x34e   :  { %v1204_v15 = vsel %vm1203_vm9, %v1200_v14, 0.0 }
 0x34f   :  { %v1206_v12 = vadd.f32 %v1204_v15, %v2600_v6 }
 0x351   :  { %1208 = vrot.lane.b32.xlu0 %v1206_v12, %s1984_s1 }
 0x355   :  { %v1202_v16 = vpop.permute.xlu2 %1201 }
 0x356   :  { %v1205_v17 = vsel %vm1203_vm9, %v1202_v16, 0.0  ;;  %vm1320_vm9 = vcmp.lt.s32.totalorder %v2591_v32, 9 }
 0x357   :  { %v1207_v18 = vadd.f32 %v1205_v17, %v2609_v13 }
 0x359   :  { %1210 = vrot.lane.b32.xlu1 %v1207_v18, %s1984_s1 }
 0x3c3   :  { %v1209_v19 = vpop.permute.xlu0 %1208 }
 0x3c4   :  { %v1213_v20 = vsel %vm1212_vm10, %v1209_v19, 0.0 }
 0x3c5   :  { %v1215_v21 = vadd.f32 %v1213_v20, %v1206_v12 }
 0x3c7   :  { %1217 = vrot.lane.b32.xlu2 %v1215_v21, %s1985_s12 }
 0x3cb   :  { %v1211_v22 = vpop.permute.xlu1 %1210 }
 0x3cc   :  { %v1214_v23 = vsel %vm1212_vm10, %v1211_v22, 0.0 }
 0x3cd   :  { %v1216_v24 = vadd.f32 %v1214_v23, %v1207_v18 }
 0x3cf   :  { %1219 = vrot.lane.b32.xlu2 %v1216_v24, %s1985_s12 }
 0x421   :  { %v1218_v25 = vpop.permute.xlu2 %1217 }
 0x422   :  { %v1222_v26 = vsel %vm1221_vm11, %v1218_v25, 0.0 }
 0x423   :  { %v1224_v27 = vadd.f32 %v1222_v26, %v1215_v21 }
 0x425   :  { %1226 = vrot.lane.b32.xlu2 %v1224_v27, %s1986_s9 }
 0x429   :  { %v1220_v28 = vpop.permute.xlu2 %1219 }
 0x42a   :  { %v1223_v30 = vsel %vm1221_vm11, %v1220_v28, 0.0 }
 0x42b   :  { %v1225_v31 = vadd.f32 %v1223_v30, %v1216_v24 }
 0x42d   :  { %1228 = vrot.lane.b32.xlu0 %v1225_v31, %s1986_s9 }
 0x47f   :  { %v1227_v33 = vpop.permute.xlu2 %1226 }
 0x480   :  { %v1231_v34 = vsel %vm1230_vm12, %v1227_v33, 0.0 }
 0x481   :  { %v1233_v35 = vadd.f32 %v1231_v34, %v1224_v27 }
 0x483   :  { %1235 = vrot.lane.b32.xlu2 %v1233_v35, %s1987_s13 }
 0x49f   :  { %v1229_v36 = vpop.permute.xlu0 %1228 }
 0x4a0   :  { %v1232_v37 = vsel %vm1230_vm12, %v1229_v36, 0.0  ;;  %v1312_v36 = vstv %s2639_s18 }
 0x4a1   :  { %v1234_v38 = vadd.f32 %v1232_v37, %v1225_v31 }
 0x4a3   :  { %1237 = vrot.lane.b32.xlu1 %v1234_v38, %s1987_s13 }
 0x4dd   :  { %v1236_v39 = vpop.permute.xlu2 %1235 }
 0x4de   :  { %v1240_v40 = vsel %vm1239_vm13, %v1236_v39, 0.0  ;;  %v1315_v39 = vstv %s2643_s19 }
 0x4df   :  { %v1242_v41 = vadd.f32 %v1240_v40, %v1233_v35 }
 0x4e1   :  { %1244 = vrot.lane.b32.xlu0 %v1242_v41, %s1988_s14 }
 0x515   :  { %v1238_v42 = vpop.permute.xlu1 %1237 }
 0x516   :  { %v1241_v43 = vsel %vm1239_vm13, %v1238_v42, 0.0 }
 0x517   :  { %v1243_v44 = vadd.f32 %v1241_v43, %v1234_v38 }
 0x519   :  { %1246 = vrot.lane.b32.xlu2 %v1243_v44, %s1988_s14 }
 0x542   :  { %1116 = vadd.xlane.f32.xlu2 %v1114_v50 }
 0x553   :  { %v1245_v51 = vpop.permute.xlu0 %1244 }
 0x554   :  { %v1249_v52 = vsel %vm1248_vm14, %v1245_v51, 0.0 }
 0x555   :  { %v1251_v53 = vadd.f32 %v1249_v52, %v1242_v41 }
 0x557   :  { %1253 = vrot.lane.b32.xlu1 %v1251_v53, %s1989_s15 }
 0x573   :  { %v1247_v54 = vpop.permute.xlu2 %1246 }
 0x574   :  { %v1250_v56 = vsel %vm1248_vm14, %v1247_v54, 0.0 }
 0x575   :  { %v1252_v57 = vadd.f32 %v1250_v56, %v1243_v44 }
 0x577   :  { %1255 = vrot.lane.b32.xlu0 %v1252_v57, %s1989_s15 }
 0x581   :  { %1118 = vadd.xlane.f32.xlu1 %v1115_v60 }
 0x5b5   :  { %v1117_v61 = vpop.xlane.xlu2 %1116 }
 0x5b6   :  { %v1120_v62 = vmax.f32 %v1117_v61, 1e-24 }
 0x5b8   :  { %1956 = vrsqrt.f32 %v1120_v62  ;;  %vm1128_vm0 = vweird.f32 %v1120_v62 }
 0x5be   :  { %v1957_v63 = vpop.eup %1956 }
 0x5bf   :  { %v1123_v0 = vmul.f32 %v1957_v63, %v1120_v62  ;;  %vm1129_vm15 = vweird.f32 %v1957_v63 }
 0x5c0   :  { %vm1130_vm2 = vmor %vm1128_vm0, %vm1129_vm15 }
 0x5c1   :  { %v1124_v1 = vmul.f32 %v1957_v63, %v1123_v0 }
 0x5c3   :  { %v1125_v2 = vmul.f32 0.5, %v1124_v1 }
 0x5c5   :  { %v1126_v3 = vsub.f32 1.5, %v1125_v2 }
 0x5c7   :  { %v1127_v4 = vmul.f32 %v1957_v63, %v1126_v3 }
 0x5c9   :  { %v1131_v5 = vsel %vm1130_vm2, %v1957_v63, %v1127_v4  ;;  %v1254_v7 = vpop.permute.xlu1 %1253 }
 0x5ca   :  { %v1142_v8 = vmul.f32 %v1131_v5, %v1082_v49  ;;  %v1258_v9 = vsel %vm1257_vm1, %v1254_v7, 0.0 }
 0x5cb   :  { %v1260_v10 = vadd.f32 %v1258_v9, %v1251_v53 }
 0x5cc   :  { %1144 = vst [vmem:[%s2676_s8] sm:$0xff] %v1142_v8 }
 0x5cd   :  { %v1262_v11 = vsub.f32 %v1260_v10, %v2600_v6 }
 0x5cf   :  { %v1264_v14 = vsub.f32 1.0, %v1262_v11 }
 0x5d1   :  { %vm1266_vm3 = vcmp.le.f32.partialorder %v1264_v14, 0.0 }
 0x5d2   :  { %v1268_v15 = vsel %vm1266_vm3, 1.0, %v1264_v14 }
 0x5d3   :  { %1958 = vrcp.f32 %v1268_v15  ;;  %v1281_v18 = vand.u32 2147483648, %v1268_v15  ;;  %v1279_v20 = vand.u32 2147483647, %v1268_v15  ;;  %vm1275_vm5 = vweird.f32 %v1268_v15 }
 0x5d5   :  { %v1282_v22 = vor.u32 1.1754944e-38, %v1281_v18  ;;  %vm1280_vm7 = vcmp.eq.f32.partialorder %v1279_v20, 8.507059e+37 }
 0x5d9   :  { %v1959_v12 = vpop.eup %1958 }
 0x5da   :  { %v1271_v16 = vmul.f32 %v1959_v12, %v1268_v15  ;;  %vm1276_vm4 = vweird.f32 %v1959_v12 }
 0x5db   :  { %vm1277_vm6 = vmor %vm1275_vm5, %vm1276_vm4 }
 0x5dc   :  { %v1272_v17 = vsub.f32 1.0, %v1271_v16 }
 0x5de   :  { %v1273_v19 = vmul.f32 %v1959_v12, %v1272_v17 }
 0x5e0   :  { %v1274_v21 = vadd.f32 %v1959_v12, %v1273_v19 }
 0x5e2   :  { %v1278_v23 = vsel %vm1277_vm6, %v1959_v12, %v1274_v21 }
 0x5e3   :  { %v1283_v24 = vsel %vm1280_vm7, %v1282_v22, %v1278_v23 }
 0x5e4   :  { %v1284_v25 = vmul.f32 %v1283_v24, %v2600_v6 }
 0x5e6   :  { %v1300_v26 = vsel %vm1266_vm3, 0.0, %v1284_v25 }
 0x5e7   :  { %v1302_v27 = vmin.f32 %v1300_v26, 0.9999999 }
 0x5e9   :  { %v1306_v28 = vsub.f32 1.0, %v1302_v27  ;;  %v1256_v30 = vpop.permute.xlu0 %1255 }
 0x5ea   :  { %v1259_v31 = vsel %vm1257_vm1, %v1256_v30, 0.0 }
 0x5eb   :  { %1960 = vlog2.f32 %v1306_v28  ;;  %v1261_v33 = vadd.f32 %v1259_v31, %v1252_v57 }
 0x5ed   :  { %v1263_v34 = vsub.f32 %v1261_v33, %v2609_v13 }
 0x5ef   :  { %v1265_v35 = vsub.f32 1.0, %v1263_v34 }
 0x5f1   :  { %v1961_v6 = vpop.eup %1960  ;;  %vm1267_vm8 = vcmp.le.f32.partialorder %v1265_v35, 0.0 }
 0x5f2   :  { %v1309_v37 = vmul.f32 0.6931472, %v1961_v6  ;;  %v1269_v38 = vsel %vm1267_vm8, 1.0, %v1265_v35 }
 0x5f3   :  { %1962 = vrcp.f32 %v1269_v38  ;;  %v1296_v50 = vand.u32 2147483648, %v1269_v38  ;;  %v1294_v52 = vand.u32 2147483647, %v1269_v38  ;;  %vm1290_vm11 = vweird.f32 %v1269_v38 }
 0x5f4   :  { %v1313_v40 = vmul.f32 %v1312_v36, %v1309_v37  ;;  %v1119_v41 = vpop.xlane.xlu1 %1118 }
 0x5f5   :  { %v1121_v42 = vmax.f32 %v1119_v41, 1e-24  ;;  %v1297_v56 = vor.u32 1.1754944e-38, %v1296_v50  ;;  %vm1295_vm13 = vcmp.eq.f32.partialorder %v1294_v52, 8.507059e+37 }
 0x5f6   :  { %v1316_v43 = vadd.f32 %v1315_v39, %v1313_v40 }
 0x5f7   :  { %1964 = vrsqrt.f32 %v1121_v42  ;;  %vm1138_vm15 = vweird.f32 %v1121_v42 }
 0x5f8   :  { %v1318_v44 = vsel %vm1266_vm3, 0.0, %v1316_v43 }
 0x5f9   :  { %v1963_v45 = vpop.eup %1962  ;;  %v1321_v46 = vsel %vm1320_vm9, %v1318_v44, 0.0 }
 0x5fa   :  { %1323 = vst [vmem:[%s2678_s10] sm:$0xff] %v1321_v46  ;;  %v1286_v47 = vmul.f32 %v1963_v45, %v1269_v38  ;;  %vm1291_vm10 = vweird.f32 %v1963_v45 }
 0x5fb   :  { %vm1292_vm12 = vmor %vm1290_vm11, %vm1291_vm10 }
 0x5fc   :  { %v1287_v48 = vsub.f32 1.0, %v1286_v47 }
 0x5fd   :  { %v1965_v49 = vpop.eup %1964 }
 0x5fe   :  { %v1288_v51 = vmul.f32 %v1963_v45, %v1287_v48  ;;  %v1133_v53 = vmul.f32 %v1965_v49, %v1121_v42  ;;  %vm1139_vm14 = vweird.f32 %v1965_v49 }
 0x5ff   :  { %vm1140_vm0 = vmor %vm1138_vm15, %vm1139_vm14 }
 0x600   :  { %v1289_v54 = vadd.f32 %v1963_v45, %v1288_v51  ;;  %v1134_v55 = vmul.f32 %v1965_v49, %v1133_v53 }
 0x602   :  { %v1293_v57 = vsel %vm1292_vm12, %v1963_v45, %v1289_v54  ;;  %v1135_v58 = vmul.f32 0.5, %v1134_v55 }
 0x603   :  { %v1298_v29 = vsel %vm1295_vm13, %v1297_v56, %v1293_v57 }
 0x604   :  { %v1299_v60 = vmul.f32 %v1298_v29, %v2609_v13  ;;  %v1136_v61 = vsub.f32 1.5, %v1135_v58 }
 0x606   :  { %v1301_v62 = vsel %vm1267_vm8, 0.0, %v1299_v60  ;;  %v1137_v63 = vmul.f32 %v1965_v49, %v1136_v61 }
 0x607   :  { %v1303_v0 = vmin.f32 %v1301_v62, 0.9999999 }
 0x608   :  { %v1141_v1 = vsel %vm1140_vm0, %v1965_v49, %v1137_v63 }
 0x609   :  { %v1307_v2 = vsub.f32 1.0, %v1303_v0  ;;  %v1143_v3 = vmul.f32 %v1141_v1, %v2625_v59 }
 0x60b   :  { %1966 = vlog2.f32 %v1307_v2  ;;  %1145 = vst [vmem:[%s2676_s8 + $0x8] sm:$0xff] %v1143_v3 }
 0x611   :  { %v1967_v4 = vpop.eup %1966 }
 0x612   :  { %v1311_v5 = vmul.f32 0.6931472, %v1967_v4 }
 0x614   :  { %v1314_v13 = vmul.f32 %v1312_v36, %v1311_v5 }
 0x616   :  { %v1317_v7 = vadd.f32 %v1315_v39, %v1314_v13 }
 0x618   :  { %v1319_v8 = vsel %vm1267_vm8, 0.0, %v1317_v7 }
 0x619   :  { %v1322_v9 = vsel %vm1320_vm9, %v1319_v8, 0.0 }
 0x61a   :  { %1324 = vst [vmem:[%s2678_s10 + $0x8] sm:$0xff] %v1322_v9 }
 0x61b   :  { %1337 = vsyncpa [#allocation3], 1 }

</bundles_post_ra>
